<compile_context>
chip_gen: v7x
topology: tpu7x:2x2x1
jax: 0.10.0
libtpu: 0.0.40
codegen_flags: <defaults>
</compile_context>

<pallas_src>
import functools

import numpy as np
import jax
import jax.numpy as jnp
from jax.experimental import pallas as pl
from jax.experimental.pallas import tpu as pltpu


def _bottleneck_kernel(*refs, H, W, Cin, P, Ho, Wo, stride, has_projection,
                       staging_bf16):
    if has_projection:
        (x_ref, w1_ref, b1_ref, w2_ref, b2_ref, w3_ref, b3_ref,
         ws_ref, bs_ref, o_ref, pad_ref, col_ref) = refs
    else:
        (x_ref, w1_ref, b1_ref, w2_ref, b2_ref, w3_ref, b3_ref,
         o_ref, pad_ref, col_ref) = refs

    Cout = 4 * P
    f32 = jnp.float32
    bf16 = jnp.bfloat16
    pad_dt = bf16 if staging_bf16 else f32

    def sds(start, size):
        # Strided slice helper: unit slice when stride == 1, strided otherwise.
        if stride == 1:
            return pl.ds(start, size)
        return pl.ds(start, size, stride=stride)

    # ---- conv1 (1x1, no bias, bn1 scale folded into w1) + bias + relu ----
    x2d = x_ref[...].reshape(H * W, Cin)                        # f32 (HW, Cin)
    h1 = jnp.dot(x2d.astype(bf16), w1_ref[...],
                 preferred_element_type=f32)                    # (HW, P)
    h1 = jnp.maximum(h1 + b1_ref[...], 0.0)

    # ---- conv2 (3x3, pad=1, stride), bn2 scale folded into w2 ----
    # Stage h1 into a 1-pixel-padded scratch; only the halo is zeroed (the
    # interior is fully overwritten every grid step).
    pad_ref[0:1, :, :] = jnp.zeros((1, W + 2, P), pad_dt)
    pad_ref[H + 1:H + 2, :, :] = jnp.zeros((1, W + 2, P), pad_dt)
    pad_ref[:, 0:1, :] = jnp.zeros((H + 2, 1, P), pad_dt)
    pad_ref[:, W + 1:W + 2, :] = jnp.zeros((H + 2, 1, P), pad_dt)
    pad_ref[pl.ds(1, H), pl.ds(1, W), :] = h1.reshape(H, W, P).astype(pad_dt)

    # im2col: gather the 9 (strided) taps into one (Ho*Wo, 9P) bf16 buffer and
    # do a single K=9P matmul (fills the MXU contraction dim; one MRF/MRB pop).
    for dy in range(3):
        for dx in range(3):
            t = dy * 3 + dx
            patch = pad_ref[sds(dy, Ho), sds(dx, Wo), :]        # (Ho, Wo, P)
            col_ref[:, t * P:(t + 1) * P] = (
                patch.reshape(Ho * Wo, P).astype(bf16))
    h2 = jnp.dot(col_ref[...], w2_ref[...], preferred_element_type=f32)
    h2 = jnp.maximum(h2 + b2_ref[...], 0.0)                     # (HoWo, P)

    # ---- conv3 (1x1; bn3 scale folded into w3, conv bias folded into b3) ----
    h3 = jnp.dot(h2.astype(bf16), w3_ref[...], preferred_element_type=f32)
    h3 = h3 + b3_ref[...]                                       # (HoWo, 4P)

    # ---- shortcut ----
    if has_projection:
        if stride == 1:
            xs2d = x2d
        else:
            xs = x_ref[pl.ds(0, 1), sds(0, Ho), sds(0, Wo), :]  # (1, Ho, Wo, Cin)
            xs2d = xs.reshape(Ho * Wo, Cin)
        sc = jnp.dot(xs2d.astype(bf16), ws_ref[...], preferred_element_type=f32)
        sc = sc + bs_ref[...]
    else:
        sc = x2d                                                # identity, exact f32

    out = jnp.maximum(h3 + sc, 0.0)
    o_ref[...] = out.reshape(1, Ho, Wo, Cout).astype(o_ref.dtype)


def _vmem_capacity_bytes(default=64 * 1024 * 1024):
    """Per-core VMEM capacity; conservative 64 MiB default if unqueryable."""
    try:
        info = pltpu.get_tpu_info()
        for attr in ("vmem_capacity_bytes", "vmem_bytes", "vmem_size_bytes"):
            v = getattr(info, attr, None)
            if v:
                return int(v)
    except Exception:
        pass
    return default


def bottleneck_forward(x_nchw, params, stride):
    N, Cin, H, W = x_nchw.shape
    P = params["w1"].shape[1]
    Cout = 4 * P
    Ho = (H + 2 - 3) // stride + 1
    Wo = (W + 2 - 3) // stride + 1
    has_projection = bool(params["has_shortcut"])

    x = jnp.transpose(x_nchw, (0, 2, 3, 1)).astype(jnp.float32)   # NCHW -> NHWC

    bf16 = jnp.bfloat16
    # Fold per-output-channel BN scales into the conv weights (f32 fold, then
    # bf16 cast); fold conv3's bias through bn3 into a single bias vector.
    w1 = (params["w1"] * params["s1"]).astype(bf16)                   # (Cin, P)
    b1 = params["b1"]
    w2 = (params["w2_hwio"] * params["s2"].reshape(1, 1, 1, P)
          ).reshape(9 * P, P).astype(bf16)                            # (9P, P)
    b2 = params["b2"]
    w3 = (params["w3"] * params["s3"]).astype(bf16)                   # (P, 4P)
    b3 = params["cb3"] * params["s3"] + params["b3"]
    if has_projection:
        ws = (params["ws"] * params["ss"]).astype(bf16)
        bs = params["bs"]

    def run(staging_bf16, single_buffer_consts):
        kernel = functools.partial(
            _bottleneck_kernel, H=H, W=W, Cin=Cin, P=P, Ho=Ho, Wo=Wo,
            stride=stride, has_projection=has_projection,
            staging_bf16=staging_bf16)

        const_kw = (dict(pipeline_mode=pl.Buffered(1))
                    if single_buffer_consts else {})

        def const(shape):
            # Grid-invariant operands (weights/biases): constant index map,
            # optionally single-buffered so they hold only one VMEM copy.
            return pl.BlockSpec(shape, lambda n, _r=len(shape): (0,) * _r,
                                **const_kw)

        in_specs = [
            pl.BlockSpec((1, H, W, Cin), lambda n: (n, 0, 0, 0)),     # x
            const((Cin, P)), const((1, P)),                           # conv1/bn1
            const((9 * P, P)), const((1, P)),                         # conv2/bn2
            const((P, Cout)), const((1, Cout)),                       # conv3/bn3
        ]
        args = [x, w1, b1, w2, b2, w3, b3]
        if has_projection:
            in_specs += [const((Cin, Cout)), const((1, Cout))]
            args += [ws, bs]

        pad_dt = jnp.bfloat16 if staging_bf16 else jnp.float32
        pad_bpe = 2 if staging_bf16 else 4

        # Scoped-VMEM limit from the actual working set: double-buffered x/out
        # blocks, weights (x1 if single-buffered), scratch buffers and live
        # f32 intermediates, plus 25% headroom.  Capped per TPU generation.
        wbuf = 1 if single_buffer_consts else 2
        x_blk = H * W * Cin * 4
        o_blk = Ho * Wo * Cout * 4
        wts = (Cin * P + 9 * P * P + P * Cout
               + (Cin * Cout if has_projection else 0)) * 2
        pad_b = (H + 2) * (W + 2) * P * pad_bpe
        col_b = Ho * Wo * 9 * P * 2
        live = (H * W * max(Cin, P) + Ho * Wo * (2 * Cout + P)) * 4
        need = 2 * (x_blk + o_blk) + wbuf * wts + pad_b + col_b + live
        cap = min(int(0.85 * _vmem_capacity_bytes()), 100 * 1024 * 1024)
        vmem_limit = int(min(max(int(1.25 * need), 32 * 1024 * 1024), cap))

        return pl.pallas_call(
            kernel,
            out_shape=jax.ShapeDtypeStruct((N, Ho, Wo, Cout), jnp.float32),
            grid_spec=pltpu.PrefetchScalarGridSpec(
                num_scalar_prefetch=0,
                grid=(N,),
                in_specs=in_specs,
                out_specs=pl.BlockSpec((1, Ho, Wo, Cout),
                                       lambda n: (n, 0, 0, 0)),
                scratch_shapes=[
                    pltpu.VMEM((H + 2, W + 2, P), pad_dt),        # padded h1
                    pltpu.VMEM((Ho * Wo, 9 * P), jnp.bfloat16),   # im2col
                ]),
            compiler_params=pltpu.CompilerParams(
                dimension_semantics=("parallel",),
                vmem_limit_bytes=vmem_limit),
        )(*args)

    # Feature ladder: prefer (bf16 staging [stride 1 only], single-buffered
    # constants); gracefully fall back if the local Mosaic build rejects
    # packed-sublane-offset stores or pipeline_mode.  All configs are
    # numerically equivalent.
    configs = []
    for sb in ((True, False) if stride == 1 else (False,)):
        for single in (True, False):
            configs.append((sb, single))
    out = None
    last_err = None
    for sb, single in configs:
        try:
            out = jax.block_until_ready(run(sb, single))
            break
        except Exception as e:   # lowering/compile feature probe
            last_err = e
    if out is None:
        raise last_err

    return jnp.transpose(out, (0, 3, 1, 2))                      # NHWC -> NCHW


def init_params(key, in_planes, planes, stride, eps=1e-5):
    """Deterministic synthetic parameters matching Bottleneck.__init__ shapes.

    BatchNorm uses inference (running-stat) semantics folded into per-channel
    scale/bias.
    """
    Cout = 4 * planes
    keys = jax.random.split(key, 10)

    def bn(k, c):
        kg, kb, km, kv = jax.random.split(k, 4)
        gamma = 1.0 + 0.1 * jax.random.normal(kg, (c,), jnp.float32)
        beta = 0.1 * jax.random.normal(kb, (c,), jnp.float32)
        mean = 0.1 * jax.random.normal(km, (c,), jnp.float32)
        var = jax.random.uniform(kv, (c,), jnp.float32, 0.5, 1.5)
        scale = gamma / jnp.sqrt(var + eps)
        bias = beta - mean * scale
        return scale.reshape(1, c), bias.reshape(1, c)

    w1 = 0.1 * jax.random.normal(keys[0], (in_planes, planes), jnp.float32)
    s1, b1 = bn(keys[1], planes)
    w2_hwio = 0.1 * jax.random.normal(keys[2], (3, 3, planes, planes), jnp.float32)
    s2, b2 = bn(keys[3], planes)
    w3 = 0.1 * jax.random.normal(keys[4], (planes, Cout), jnp.float32)
    cb3 = 0.1 * jax.random.normal(keys[5], (1, Cout), jnp.float32)
    s3, b3 = bn(keys[6], Cout)

    has_shortcut = (stride != 1) or (in_planes != Cout)
    p = dict(w1=w1, s1=s1, b1=b1,
             w2_hwio=w2_hwio, s2=s2, b2=b2,
             w3=w3, cb3=cb3, s3=s3, b3=b3,
             has_shortcut=has_shortcut)
    if has_shortcut:
        p["ws"] = 0.1 * jax.random.normal(keys[7], (in_planes, Cout), jnp.float32)
        p["ss"], p["bs"] = bn(keys[8], Cout)
    return p


def ref_forward(x_nchw, params, stride):
    """Pure-JAX (XLA conv, f32 HIGHEST) reference of the Bottleneck forward."""
    x = jnp.transpose(x_nchw, (0, 2, 3, 1)).astype(jnp.float32)
    conv = lambda h, w, s, pad: jax.lax.conv_general_dilated(
        h, w, (s, s), pad, dimension_numbers=("NHWC", "HWIO", "NHWC"),
        precision=jax.lax.Precision.HIGHEST)
    Cin = x.shape[-1]
    P = params["w1"].shape[1]
    Cout = 4 * P

    h = conv(x, params["w1"].reshape(1, 1, Cin, P), 1, "VALID")
    h = jnp.maximum(h * params["s1"] + params["b1"], 0.0)
    h = conv(h, params["w2_hwio"], stride, [(1, 1), (1, 1)])
    h = jnp.maximum(h * params["s2"] + params["b2"], 0.0)
    h = conv(h, params["w3"].reshape(1, 1, P, Cout), 1, "VALID") + params["cb3"]
    h = h * params["s3"] + params["b3"]
    if params["has_shortcut"]:
        sc = conv(x, params["ws"].reshape(1, 1, Cin, Cout), stride, "VALID")
        sc = sc * params["ss"] + params["bs"]
    else:
        sc = x
    out = jnp.maximum(h + sc, 0.0)
    return jnp.transpose(out, (0, 3, 1, 2))


if __name__ == "__main__":
    key = jax.random.PRNGKey(0)

    cases = [
        # (N, in_planes, planes, H, W, stride)
        (2, 4, 4, 16, 16, 2),    # projection shortcut + stride-2 paths
        (2, 16, 4, 16, 16, 1),   # identity shortcut (specialized kernel)
    ]
    for idx, (N, in_planes, planes, H, W, stride) in enumerate(cases):
        kx, kp = jax.random.split(jax.random.fold_in(key, idx))
        x = jax.random.normal(kx, (N, in_planes, H, W), jnp.float32)
        params = init_params(kp, in_planes, planes, stride)

        out = jax.block_until_ready(bottleneck_forward(x, params, stride))
        ref = ref_forward(x, params, stride)
        assert out.shape == ref.shape, (out.shape, ref.shape)
        # Accuracy contract: bf16 MXU operands / f32 accumulation vs. an f32
        # HIGHEST-precision reference -> rtol/atol = 1e-2.
        np.testing.assert_allclose(np.asarray(out), np.asarray(ref),
                                   rtol=1e-2, atol=1e-2)
    print("KERNEL_OK")
</pallas_src>

<mosaic_0001>
module attributes {stable_mosaic.version = 11 : i64} {
  func.func @_bottleneck_kernel(%arg0: i32, %arg1: memref<1x16x16x4xf32, #tpu.memory_space<vmem>>, %arg2: memref<4x4xbf16, #tpu.memory_space<vmem>>, %arg3: memref<1x4xf32, #tpu.memory_space<vmem>>, %arg4: memref<36x4xbf16, #tpu.memory_space<vmem>>, %arg5: memref<1x4xf32, #tpu.memory_space<vmem>>, %arg6: memref<4x16xbf16, #tpu.memory_space<vmem>>, %arg7: memref<1x16xf32, #tpu.memory_space<vmem>>, %arg8: memref<4x16xbf16, #tpu.memory_space<vmem>>, %arg9: memref<1x16xf32, #tpu.memory_space<vmem>>, %arg10: memref<1x8x8x16xf32, #tpu.memory_space<vmem>>, %arg11: memref<18x18x4xf32, #tpu.memory_space<vmem>>, %arg12: memref<64x36xbf16, #tpu.memory_space<vmem>>) attributes {dimension_semantics = [#tpu.dimension_semantics<parallel>], iteration_bounds = array<i64: 2>, scalar_prefetch = 0 : i64, scratch_operands = 2 : i64, tpu.core_type = #tpu.core_type<tc>, window_params = [{transform_indices = @transform_0, window_bounds = array<i64: 1, 16, 16, 4>}, {pipeline_mode = #tpu.pipeline_mode<synchronous>, transform_indices = @transform_1, window_bounds = array<i64: 4, 4>}, {pipeline_mode = #tpu.pipeline_mode<synchronous>, transform_indices = @transform_2, window_bounds = array<i64: 1, 4>}, {pipeline_mode = #tpu.pipeline_mode<synchronous>, transform_indices = @transform_3, window_bounds = array<i64: 36, 4>}, {pipeline_mode = #tpu.pipeline_mode<synchronous>, transform_indices = @transform_4, window_bounds = array<i64: 1, 4>}, {pipeline_mode = #tpu.pipeline_mode<synchronous>, transform_indices = @transform_5, window_bounds = array<i64: 4, 16>}, {pipeline_mode = #tpu.pipeline_mode<synchronous>, transform_indices = @transform_6, window_bounds = array<i64: 1, 16>}, {pipeline_mode = #tpu.pipeline_mode<synchronous>, transform_indices = @transform_7, window_bounds = array<i64: 4, 16>}, {pipeline_mode = #tpu.pipeline_mode<synchronous>, transform_indices = @transform_8, window_bounds = array<i64: 1, 16>}, {transform_indices = @transform_9, window_bounds = array<i64: 1, 8, 8, 16>}]} {
    %c0 = arith.constant 0 : index
    %c0_0 = arith.constant 0 : index
    %c0_1 = arith.constant 0 : index
    %c0_2 = arith.constant 0 : index
    %0 = vector.load %arg1[%c0, %c0_0, %c0_1, %c0_2] : memref<1x16x16x4xf32, #tpu.memory_space<vmem>>, vector<1x16x16x4xf32>
    %1 = vector.shape_cast %0 : vector<1x16x16x4xf32> to vector<256x4xf32>
    %2 = arith.truncf %1 : vector<256x4xf32> to vector<256x4xbf16>
    %c0_3 = arith.constant 0 : index
    %c0_4 = arith.constant 0 : index
    %3 = vector.load %arg2[%c0_3, %c0_4] : memref<4x4xbf16, #tpu.memory_space<vmem>>, vector<4x4xbf16>
    %cst = arith.constant dense<0.000000e+00> : vector<256x4xf32>
    %4 = tpu.matmul %2, %3, %cst {dimension_numbers = #tpu.dot_dimension_numbers<[1], [0], [0], [1], [0, 0, 1, 1], [], []>} : vector<256x4xbf16>, vector<4x4xbf16>, vector<256x4xf32> -> vector<256x4xf32>
    %c0_5 = arith.constant 0 : index
    %c0_6 = arith.constant 0 : index
    %5 = vector.load %arg3[%c0_5, %c0_6] : memref<1x4xf32, #tpu.memory_space<vmem>>, vector<1x4xf32>
    %6 = vector.broadcast %5 : vector<1x4xf32> to vector<256x4xf32>
    %7 = arith.addf %4, %6 : vector<256x4xf32>
    %cst_7 = arith.constant 0.000000e+00 : f32
    %8 = vector.broadcast %cst_7 : f32 to vector<256x4xf32>
    %9 = arith.maximumf %7, %8 : vector<256x4xf32>
    %cst_8 = arith.constant 0.000000e+00 : f32
    %10 = vector.broadcast %cst_8 : f32 to vector<1x18x4xf32>
    %c0_9 = arith.constant 0 : index
    %c0_10 = arith.constant 0 : index
    %c0_11 = arith.constant 0 : index
    %11 = vector.load %arg11[%c0_9, %c0_10, %c0_11] : memref<18x18x4xf32, #tpu.memory_space<vmem>>, vector<1x18x4xf32>
    tpu.vector_store %arg11[%c0_9, %c0_10, %c0_11], %10 {strides = array<i32>} : memref<18x18x4xf32, #tpu.memory_space<vmem>>, vector<1x18x4xf32>,
    %cst_12 = arith.constant 0.000000e+00 : f32
    %12 = vector.broadcast %cst_12 : f32 to vector<1x18x4xf32>
    %c17 = arith.constant 17 : index
    %c0_13 = arith.constant 0 : index
    %c0_14 = arith.constant 0 : index
    %13 = vector.load %arg11[%c17, %c0_13, %c0_14] : memref<18x18x4xf32, #tpu.memory_space<vmem>>, vector<1x18x4xf32>
    tpu.vector_store %arg11[%c17, %c0_13, %c0_14], %12 {strides = array<i32>} : memref<18x18x4xf32, #tpu.memory_space<vmem>>, vector<1x18x4xf32>,
    %cst_15 = arith.constant 0.000000e+00 : f32
    %14 = vector.broadcast %cst_15 : f32 to vector<18x1x4xf32>
    %c0_16 = arith.constant 0 : index
    %c0_17 = arith.constant 0 : index
    %c0_18 = arith.constant 0 : index
    %15 = vector.load %arg11[%c0_16, %c0_17, %c0_18] : memref<18x18x4xf32, #tpu.memory_space<vmem>>, vector<18x1x4xf32>
    tpu.vector_store %arg11[%c0_16, %c0_17, %c0_18], %14 {strides = array<i32>} : memref<18x18x4xf32, #tpu.memory_space<vmem>>, vector<18x1x4xf32>,
    %cst_19 = arith.constant 0.000000e+00 : f32
    %16 = vector.broadcast %cst_19 : f32 to vector<18x1x4xf32>
    %c0_20 = arith.constant 0 : index
    %c17_21 = arith.constant 17 : index
    %c0_22 = arith.constant 0 : index
    %17 = vector.load %arg11[%c0_20, %c17_21, %c0_22] : memref<18x18x4xf32, #tpu.memory_space<vmem>>, vector<18x1x4xf32>
    tpu.vector_store %arg11[%c0_20, %c17_21, %c0_22], %16 {strides = array<i32>} : memref<18x18x4xf32, #tpu.memory_space<vmem>>, vector<18x1x4xf32>,
    %18 = vector.shape_cast %9 : vector<256x4xf32> to vector<16x16x4xf32>
    %c1 = arith.constant 1 : index
    %c1_23 = arith.constant 1 : index
    %c0_24 = arith.constant 0 : index
    %19 = vector.load %arg11[%c1, %c1_23, %c0_24] : memref<18x18x4xf32, #tpu.memory_space<vmem>>, vector<16x16x4xf32>
    tpu.vector_store %arg11[%c1, %c1_23, %c0_24], %18 {strides = array<i32>} : memref<18x18x4xf32, #tpu.memory_space<vmem>>, vector<16x16x4xf32>,
    %c0_25 = arith.constant 0 : index
    %c0_26 = arith.constant 0 : index
    %c0_27 = arith.constant 0 : index
    %20 = tpu.strided_load %arg11[%c0_25, %c0_26, %c0_27] {strides = array<i32: 2, 2, 1>} : memref<18x18x4xf32, #tpu.memory_space<vmem>>, vector<8x8x4xf32>
    %21 = vector.shape_cast %20 : vector<8x8x4xf32> to vector<64x4xf32>
    %22 = arith.truncf %21 : vector<64x4xf32> to vector<64x4xbf16>
    %c0_28 = arith.constant 0 : index
    %c0_29 = arith.constant 0 : index
    %23 = vector.load %arg12[%c0_28, %c0_29] : memref<64x36xbf16, #tpu.memory_space<vmem>>, vector<64x4xbf16>
    tpu.vector_store %arg12[%c0_28, %c0_29], %22 {strides = array<i32>} : memref<64x36xbf16, #tpu.memory_space<vmem>>, vector<64x4xbf16>,
    %c0_30 = arith.constant 0 : index
    %c1_31 = arith.constant 1 : index
    %c0_32 = arith.constant 0 : index
    %24 = tpu.strided_load %arg11[%c0_30, %c1_31, %c0_32] {strides = array<i32: 2, 2, 1>} : memref<18x18x4xf32, #tpu.memory_space<vmem>>, vector<8x8x4xf32>
    %25 = vector.shape_cast %24 : vector<8x8x4xf32> to vector<64x4xf32>
    %26 = arith.truncf %25 : vector<64x4xf32> to vector<64x4xbf16>
    %c0_33 = arith.constant 0 : index
    %c4 = arith.constant 4 : index
    %27 = vector.load %arg12[%c0_33, %c4] : memref<64x36xbf16, #tpu.memory_space<vmem>>, vector<64x4xbf16>
    tpu.vector_store %arg12[%c0_33, %c4], %26 {strides = array<i32>} : memref<64x36xbf16, #tpu.memory_space<vmem>>, vector<64x4xbf16>,
    %c0_34 = arith.constant 0 : index
    %c2 = arith.constant 2 : index
    %c0_35 = arith.constant 0 : index
    %28 = tpu.strided_load %arg11[%c0_34, %c2, %c0_35] {strides = array<i32: 2, 2, 1>} : memref<18x18x4xf32, #tpu.memory_space<vmem>>, vector<8x8x4xf32>
    %29 = vector.shape_cast %28 : vector<8x8x4xf32> to vector<64x4xf32>
    %30 = arith.truncf %29 : vector<64x4xf32> to vector<64x4xbf16>
    %c0_36 = arith.constant 0 : index
    %c8 = arith.constant 8 : index
    %31 = vector.load %arg12[%c0_36, %c8] : memref<64x36xbf16, #tpu.memory_space<vmem>>, vector<64x4xbf16>
    tpu.vector_store %arg12[%c0_36, %c8], %30 {strides = array<i32>} : memref<64x36xbf16, #tpu.memory_space<vmem>>, vector<64x4xbf16>,
    %c1_37 = arith.constant 1 : index
    %c0_38 = arith.constant 0 : index
    %c0_39 = arith.constant 0 : index
    %32 = tpu.strided_load %arg11[%c1_37, %c0_38, %c0_39] {strides = array<i32: 2, 2, 1>} : memref<18x18x4xf32, #tpu.memory_space<vmem>>, vector<8x8x4xf32>
    %33 = vector.shape_cast %32 : vector<8x8x4xf32> to vector<64x4xf32>
    %34 = arith.truncf %33 : vector<64x4xf32> to vector<64x4xbf16>
    %c0_40 = arith.constant 0 : index
    %c12 = arith.constant 12 : index
    %35 = vector.load %arg12[%c0_40, %c12] : memref<64x36xbf16, #tpu.memory_space<vmem>>, vector<64x4xbf16>
    tpu.vector_store %arg12[%c0_40, %c12], %34 {strides = array<i32>} : memref<64x36xbf16, #tpu.memory_space<vmem>>, vector<64x4xbf16>,
    %c1_41 = arith.constant 1 : index
    %c1_42 = arith.constant 1 : index
    %c0_43 = arith.constant 0 : index
    %36 = tpu.strided_load %arg11[%c1_41, %c1_42, %c0_43] {strides = array<i32: 2, 2, 1>} : memref<18x18x4xf32, #tpu.memory_space<vmem>>, vector<8x8x4xf32>
    %37 = vector.shape_cast %36 : vector<8x8x4xf32> to vector<64x4xf32>
    %38 = arith.truncf %37 : vector<64x4xf32> to vector<64x4xbf16>
    %c0_44 = arith.constant 0 : index
    %c16 = arith.constant 16 : index
    %39 = vector.load %arg12[%c0_44, %c16] : memref<64x36xbf16, #tpu.memory_space<vmem>>, vector<64x4xbf16>
    tpu.vector_store %arg12[%c0_44, %c16], %38 {strides = array<i32>} : memref<64x36xbf16, #tpu.memory_space<vmem>>, vector<64x4xbf16>,
    %c1_45 = arith.constant 1 : index
    %c2_46 = arith.constant 2 : index
    %c0_47 = arith.constant 0 : index
    %40 = tpu.strided_load %arg11[%c1_45, %c2_46, %c0_47] {strides = array<i32: 2, 2, 1>} : memref<18x18x4xf32, #tpu.memory_space<vmem>>, vector<8x8x4xf32>
    %41 = vector.shape_cast %40 : vector<8x8x4xf32> to vector<64x4xf32>
    %42 = arith.truncf %41 : vector<64x4xf32> to vector<64x4xbf16>
    %c0_48 = arith.constant 0 : index
    %c20 = arith.constant 20 : index
    %43 = vector.load %arg12[%c0_48, %c20] : memref<64x36xbf16, #tpu.memory_space<vmem>>, vector<64x4xbf16>
    tpu.vector_store %arg12[%c0_48, %c20], %42 {strides = array<i32>} : memref<64x36xbf16, #tpu.memory_space<vmem>>, vector<64x4xbf16>,
    %c2_49 = arith.constant 2 : index
    %c0_50 = arith.constant 0 : index
    %c0_51 = arith.constant 0 : index
    %44 = tpu.strided_load %arg11[%c2_49, %c0_50, %c0_51] {strides = array<i32: 2, 2, 1>} : memref<18x18x4xf32, #tpu.memory_space<vmem>>, vector<8x8x4xf32>
    %45 = vector.shape_cast %44 : vector<8x8x4xf32> to vector<64x4xf32>
    %46 = arith.truncf %45 : vector<64x4xf32> to vector<64x4xbf16>
    %c0_52 = arith.constant 0 : index
    %c24 = arith.constant 24 : index
    %47 = vector.load %arg12[%c0_52, %c24] : memref<64x36xbf16, #tpu.memory_space<vmem>>, vector<64x4xbf16>
    tpu.vector_store %arg12[%c0_52, %c24], %46 {strides = array<i32>} : memref<64x36xbf16, #tpu.memory_space<vmem>>, vector<64x4xbf16>,
    %c2_53 = arith.constant 2 : index
    %c1_54 = arith.constant 1 : index
    %c0_55 = arith.constant 0 : index
    %48 = tpu.strided_load %arg11[%c2_53, %c1_54, %c0_55] {strides = array<i32: 2, 2, 1>} : memref<18x18x4xf32, #tpu.memory_space<vmem>>, vector<8x8x4xf32>
    %49 = vector.shape_cast %48 : vector<8x8x4xf32> to vector<64x4xf32>
    %50 = arith.truncf %49 : vector<64x4xf32> to vector<64x4xbf16>
    %c0_56 = arith.constant 0 : index
    %c28 = arith.constant 28 : index
    %51 = vector.load %arg12[%c0_56, %c28] : memref<64x36xbf16, #tpu.memory_space<vmem>>, vector<64x4xbf16>
    tpu.vector_store %arg12[%c0_56, %c28], %50 {strides = array<i32>} : memref<64x36xbf16, #tpu.memory_space<vmem>>, vector<64x4xbf16>,
    %c2_57 = arith.constant 2 : index
    %c2_58 = arith.constant 2 : index
    %c0_59 = arith.constant 0 : index
    %52 = tpu.strided_load %arg11[%c2_57, %c2_58, %c0_59] {strides = array<i32: 2, 2, 1>} : memref<18x18x4xf32, #tpu.memory_space<vmem>>, vector<8x8x4xf32>
    %53 = vector.shape_cast %52 : vector<8x8x4xf32> to vector<64x4xf32>
    %54 = arith.truncf %53 : vector<64x4xf32> to vector<64x4xbf16>
    %c0_60 = arith.constant 0 : index
    %c32 = arith.constant 32 : index
    %55 = vector.load %arg12[%c0_60, %c32] : memref<64x36xbf16, #tpu.memory_space<vmem>>, vector<64x4xbf16>
    tpu.vector_store %arg12[%c0_60, %c32], %54 {strides = array<i32>} : memref<64x36xbf16, #tpu.memory_space<vmem>>, vector<64x4xbf16>,
    %c0_61 = arith.constant 0 : index
    %c0_62 = arith.constant 0 : index
    %56 = vector.load %arg12[%c0_61, %c0_62] : memref<64x36xbf16, #tpu.memory_space<vmem>>, vector<64x36xbf16>
    %c0_63 = arith.constant 0 : index
    %c0_64 = arith.constant 0 : index
    %57 = vector.load %arg4[%c0_63, %c0_64] : memref<36x4xbf16, #tpu.memory_space<vmem>>, vector<36x4xbf16>
    %cst_65 = arith.constant dense<0.000000e+00> : vector<64x4xf32>
    %58 = tpu.matmul %56, %57, %cst_65 {dimension_numbers = #tpu.dot_dimension_numbers<[1], [0], [0], [1], [0, 0, 1, 1], [], []>} : vector<64x36xbf16>, vector<36x4xbf16>, vector<64x4xf32> -> vector<64x4xf32>
    %c0_66 = arith.constant 0 : index
    %c0_67 = arith.constant 0 : index
    %59 = vector.load %arg5[%c0_66, %c0_67] : memref<1x4xf32, #tpu.memory_space<vmem>>, vector<1x4xf32>
    %60 = vector.broadcast %59 : vector<1x4xf32> to vector<64x4xf32>
    %61 = arith.addf %58, %60 : vector<64x4xf32>
    %cst_68 = arith.constant 0.000000e+00 : f32
    %62 = vector.broadcast %cst_68 : f32 to vector<64x4xf32>
    %63 = arith.maximumf %61, %62 : vector<64x4xf32>
    %64 = arith.truncf %63 : vector<64x4xf32> to vector<64x4xbf16>
    %c0_69 = arith.constant 0 : index
    %c0_70 = arith.constant 0 : index
    %65 = vector.load %arg6[%c0_69, %c0_70] : memref<4x16xbf16, #tpu.memory_space<vmem>>, vector<4x16xbf16>
    %cst_71 = arith.constant dense<0.000000e+00> : vector<64x16xf32>
    %66 = tpu.matmul %64, %65, %cst_71 {dimension_numbers = #tpu.dot_dimension_numbers<[1], [0], [0], [1], [0, 0, 1, 1], [], []>} : vector<64x4xbf16>, vector<4x16xbf16>, vector<64x16xf32> -> vector<64x16xf32>
    %c0_72 = arith.constant 0 : index
    %c0_73 = arith.constant 0 : index
    %67 = vector.load %arg7[%c0_72, %c0_73] : memref<1x16xf32, #tpu.memory_space<vmem>>, vector<1x16xf32>
    %68 = vector.broadcast %67 : vector<1x16xf32> to vector<64x16xf32>
    %69 = arith.addf %66, %68 : vector<64x16xf32>
    %c0_74 = arith.constant 0 : index
    %c0_75 = arith.constant 0 : index
    %c0_76 = arith.constant 0 : index
    %c0_77 = arith.constant 0 : index
    %70 = tpu.strided_load %arg1[%c0_74, %c0_75, %c0_76, %c0_77] {strides = array<i32: 1, 2, 2, 1>} : memref<1x16x16x4xf32, #tpu.memory_space<vmem>>, vector<1x8x8x4xf32>
    %71 = vector.shape_cast %70 : vector<1x8x8x4xf32> to vector<64x4xf32>
    %72 = arith.truncf %71 : vector<64x4xf32> to vector<64x4xbf16>
    %c0_78 = arith.constant 0 : index
    %c0_79 = arith.constant 0 : index
    %73 = vector.load %arg8[%c0_78, %c0_79] : memref<4x16xbf16, #tpu.memory_space<vmem>>, vector<4x16xbf16>
    %cst_80 = arith.constant dense<0.000000e+00> : vector<64x16xf32>
    %74 = tpu.matmul %72, %73, %cst_80 {dimension_numbers = #tpu.dot_dimension_numbers<[1], [0], [0], [1], [0, 0, 1, 1], [], []>} : vector<64x4xbf16>, vector<4x16xbf16>, vector<64x16xf32> -> vector<64x16xf32>
    %c0_81 = arith.constant 0 : index
    %c0_82 = arith.constant 0 : index
    %75 = vector.load %arg9[%c0_81, %c0_82] : memref<1x16xf32, #tpu.memory_space<vmem>>, vector<1x16xf32>
    %76 = vector.broadcast %75 : vector<1x16xf32> to vector<64x16xf32>
    %77 = arith.addf %74, %76 : vector<64x16xf32>
    %78 = arith.addf %69, %77 : vector<64x16xf32>
    %cst_83 = arith.constant 0.000000e+00 : f32
    %79 = vector.broadcast %cst_83 : f32 to vector<64x16xf32>
    %80 = arith.maximumf %78, %79 : vector<64x16xf32>
    %81 = vector.shape_cast %80 : vector<64x16xf32> to vector<1x8x8x16xf32>
    %c0_84 = arith.constant 0 : index
    %c0_85 = arith.constant 0 : index
    %c0_86 = arith.constant 0 : index
    %c0_87 = arith.constant 0 : index
    %82 = vector.load %arg10[%c0_84, %c0_85, %c0_86, %c0_87] : memref<1x8x8x16xf32, #tpu.memory_space<vmem>>, vector<1x8x8x16xf32>
    tpu.vector_store %arg10[%c0_84, %c0_85, %c0_86, %c0_87], %81 {strides = array<i32>} : memref<1x8x8x16xf32, #tpu.memory_space<vmem>>, vector<1x8x8x16xf32>,
    return
  }
  func.func @transform_0(%arg0: i32) -> (i32, i32, i32, i32) {
    %c0_i32 = arith.constant 0 : i32
    %c0_i32_0 = arith.constant 0 : i32
    %c0_i32_1 = arith.constant 0 : i32
    %c0_i32_2 = arith.constant 0 : i32
    return %arg0, %c0_i32, %c0_i32_0, %c0_i32_1 : i32, i32, i32, i32
  }
  func.func @transform_1(%arg0: i32) -> (i32, i32) {
    %c0_i32 = arith.constant 0 : i32
    %c0_i32_0 = arith.constant 0 : i32
    %c0_i32_1 = arith.constant 0 : i32
    return %c0_i32, %c0_i32_0 : i32, i32
  }
  func.func @transform_2(%arg0: i32) -> (i32, i32) {
    %c0_i32 = arith.constant 0 : i32
    %c0_i32_0 = arith.constant 0 : i32
    %c0_i32_1 = arith.constant 0 : i32
    return %c0_i32, %c0_i32_0 : i32, i32
  }
  func.func @transform_3(%arg0: i32) -> (i32, i32) {
    %c0_i32 = arith.constant 0 : i32
    %c0_i32_0 = arith.constant 0 : i32
    %c0_i32_1 = arith.constant 0 : i32
    return %c0_i32, %c0_i32_0 : i32, i32
  }
  func.func @transform_4(%arg0: i32) -> (i32, i32) {
    %c0_i32 = arith.constant 0 : i32
    %c0_i32_0 = arith.constant 0 : i32
    %c0_i32_1 = arith.constant 0 : i32
    return %c0_i32, %c0_i32_0 : i32, i32
  }
  func.func @transform_5(%arg0: i32) -> (i32, i32) {
    %c0_i32 = arith.constant 0 : i32
    %c0_i32_0 = arith.constant 0 : i32
    %c0_i32_1 = arith.constant 0 : i32
    return %c0_i32, %c0_i32_0 : i32, i32
  }
  func.func @transform_6(%arg0: i32) -> (i32, i32) {
    %c0_i32 = arith.constant 0 : i32
    %c0_i32_0 = arith.constant 0 : i32
    %c0_i32_1 = arith.constant 0 : i32
    return %c0_i32, %c0_i32_0 : i32, i32
  }
  func.func @transform_7(%arg0: i32) -> (i32, i32) {
    %c0_i32 = arith.constant 0 : i32
    %c0_i32_0 = arith.constant 0 : i32
    %c0_i32_1 = arith.constant 0 : i32
    return %c0_i32, %c0_i32_0 : i32, i32
  }
  func.func @transform_8(%arg0: i32) -> (i32, i32) {
    %c0_i32 = arith.constant 0 : i32
    %c0_i32_0 = arith.constant 0 : i32
    %c0_i32_1 = arith.constant 0 : i32
    return %c0_i32, %c0_i32_0 : i32, i32
  }
  func.func @transform_9(%arg0: i32) -> (i32, i32, i32, i32) {
    %c0_i32 = arith.constant 0 : i32
    %c0_i32_0 = arith.constant 0 : i32
    %c0_i32_1 = arith.constant 0 : i32
    %c0_i32_2 = arith.constant 0 : i32
    return %arg0, %c0_i32, %c0_i32_0, %c0_i32_1 : i32, i32, i32, i32
  }
}

module attributes {stable_mosaic.version = 11 : i64} {
  func.func @_bottleneck_kernel(%arg0: i32, %arg1: memref<1x16x16x4xf32, #tpu.memory_space<vmem>>, %arg2: memref<4x4xbf16, #tpu.memory_space<vmem>>, %arg3: memref<1x4xf32, #tpu.memory_space<vmem>>, %arg4: memref<36x4xbf16, #tpu.memory_space<vmem>>, %arg5: memref<1x4xf32, #tpu.memory_space<vmem>>, %arg6: memref<4x16xbf16, #tpu.memory_space<vmem>>, %arg7: memref<1x16xf32, #tpu.memory_space<vmem>>, %arg8: memref<4x16xbf16, #tpu.memory_space<vmem>>, %arg9: memref<1x16xf32, #tpu.memory_space<vmem>>, %arg10: memref<1x8x8x16xf32, #tpu.memory_space<vmem>>, %arg11: memref<18x18x4xf32, #tpu.memory_space<vmem>>, %arg12: memref<64x36xbf16, #tpu.memory_space<vmem>>) attributes {dimension_semantics = [#tpu.dimension_semantics<parallel>], iteration_bounds = array<i64: 2>, scalar_prefetch = 0 : i64, scratch_operands = 2 : i64, tpu.core_type = #tpu.core_type<tc>, window_params = [{transform_indices = @transform_0, window_bounds = array<i64: 1, 16, 16, 4>}, {pipeline_mode = #tpu.pipeline_mode<synchronous>, transform_indices = @transform_1, window_bounds = array<i64: 4, 4>}, {pipeline_mode = #tpu.pipeline_mode<synchronous>, transform_indices = @transform_2, window_bounds = array<i64: 1, 4>}, {pipeline_mode = #tpu.pipeline_mode<synchronous>, transform_indices = @transform_3, window_bounds = array<i64: 36, 4>}, {pipeline_mode = #tpu.pipeline_mode<synchronous>, transform_indices = @transform_4, window_bounds = array<i64: 1, 4>}, {pipeline_mode = #tpu.pipeline_mode<synchronous>, transform_indices = @transform_5, window_bounds = array<i64: 4, 16>}, {pipeline_mode = #tpu.pipeline_mode<synchronous>, transform_indices = @transform_6, window_bounds = array<i64: 1, 16>}, {pipeline_mode = #tpu.pipeline_mode<synchronous>, transform_indices = @transform_7, window_bounds = array<i64: 4, 16>}, {pipeline_mode = #tpu.pipeline_mode<synchronous>, transform_indices = @transform_8, window_bounds = array<i64: 1, 16>}, {transform_indices = @transform_9, window_bounds = array<i64: 1, 8, 8, 16>}]} {
    %c0 = arith.constant 0 : index
    %c0_0 = arith.constant 0 : index
    %c0_1 = arith.constant 0 : index
    %c0_2 = arith.constant 0 : index
    %0 = vector.load %arg1[%c0, %c0_0, %c0_1, %c0_2] : memref<1x16x16x4xf32, #tpu.memory_space<vmem>>, vector<1x16x16x4xf32>
    %1 = vector.shape_cast %0 : vector<1x16x16x4xf32> to vector<256x4xf32>
    %2 = arith.truncf %1 : vector<256x4xf32> to vector<256x4xbf16>
    %c0_3 = arith.constant 0 : index
    %c0_4 = arith.constant 0 : index
    %3 = vector.load %arg2[%c0_3, %c0_4] : memref<4x4xbf16, #tpu.memory_space<vmem>>, vector<4x4xbf16>
    %cst = arith.constant dense<0.000000e+00> : vector<256x4xf32>
    %4 = tpu.matmul %2, %3, %cst {dimension_numbers = #tpu.dot_dimension_numbers<[1], [0], [0], [1], [0, 0, 1, 1], [], []>} : vector<256x4xbf16>, vector<4x4xbf16>, vector<256x4xf32> -> vector<256x4xf32>
    %c0_5 = arith.constant 0 : index
    %c0_6 = arith.constant 0 : index
    %5 = vector.load %arg3[%c0_5, %c0_6] : memref<1x4xf32, #tpu.memory_space<vmem>>, vector<1x4xf32>
    %6 = vector.broadcast %5 : vector<1x4xf32> to vector<256x4xf32>
    %7 = arith.addf %4, %6 : vector<256x4xf32>
    %cst_7 = arith.constant 0.000000e+00 : f32
    %8 = vector.broadcast %cst_7 : f32 to vector<256x4xf32>
    %9 = arith.maximumf %7, %8 : vector<256x4xf32>
    %cst_8 = arith.constant 0.000000e+00 : f32
    %10 = vector.broadcast %cst_8 : f32 to vector<1x18x4xf32>
    %c0_9 = arith.constant 0 : index
    %c0_10 = arith.constant 0 : index
    %c0_11 = arith.constant 0 : index
    %11 = vector.load %arg11[%c0_9, %c0_10, %c0_11] : memref<18x18x4xf32, #tpu.memory_space<vmem>>, vector<1x18x4xf32>
    tpu.vector_store %arg11[%c0_9, %c0_10, %c0_11], %10 {strides = array<i32>} : memref<18x18x4xf32, #tpu.memory_space<vmem>>, vector<1x18x4xf32>,
    %cst_12 = arith.constant 0.000000e+00 : f32
    %12 = vector.broadcast %cst_12 : f32 to vector<1x18x4xf32>
    %c17 = arith.constant 17 : index
    %c0_13 = arith.constant 0 : index
    %c0_14 = arith.constant 0 : index
    %13 = vector.load %arg11[%c17, %c0_13, %c0_14] : memref<18x18x4xf32, #tpu.memory_space<vmem>>, vector<1x18x4xf32>
    tpu.vector_store %arg11[%c17, %c0_13, %c0_14], %12 {strides = array<i32>} : memref<18x18x4xf32, #tpu.memory_space<vmem>>, vector<1x18x4xf32>,
    %cst_15 = arith.constant 0.000000e+00 : f32
    %14 = vector.broadcast %cst_15 : f32 to vector<18x1x4xf32>
    %c0_16 = arith.constant 0 : index
    %c0_17 = arith.constant 0 : index
    %c0_18 = arith.constant 0 : index
    %15 = vector.load %arg11[%c0_16, %c0_17, %c0_18] : memref<18x18x4xf32, #tpu.memory_space<vmem>>, vector<18x1x4xf32>
    tpu.vector_store %arg11[%c0_16, %c0_17, %c0_18], %14 {strides = array<i32>} : memref<18x18x4xf32, #tpu.memory_space<vmem>>, vector<18x1x4xf32>,
    %cst_19 = arith.constant 0.000000e+00 : f32
    %16 = vector.broadcast %cst_19 : f32 to vector<18x1x4xf32>
    %c0_20 = arith.constant 0 : index
    %c17_21 = arith.constant 17 : index
    %c0_22 = arith.constant 0 : index
    %17 = vector.load %arg11[%c0_20, %c17_21, %c0_22] : memref<18x18x4xf32, #tpu.memory_space<vmem>>, vector<18x1x4xf32>
    tpu.vector_store %arg11[%c0_20, %c17_21, %c0_22], %16 {strides = array<i32>} : memref<18x18x4xf32, #tpu.memory_space<vmem>>, vector<18x1x4xf32>,
    %18 = vector.shape_cast %9 : vector<256x4xf32> to vector<16x16x4xf32>
    %c1 = arith.constant 1 : index
    %c1_23 = arith.constant 1 : index
    %c0_24 = arith.constant 0 : index
    %19 = vector.load %arg11[%c1, %c1_23, %c0_24] : memref<18x18x4xf32, #tpu.memory_space<vmem>>, vector<16x16x4xf32>
    tpu.vector_store %arg11[%c1, %c1_23, %c0_24], %18 {strides = array<i32>} : memref<18x18x4xf32, #tpu.memory_space<vmem>>, vector<16x16x4xf32>,
    %c0_25 = arith.constant 0 : index
    %c0_26 = arith.constant 0 : index
    %c0_27 = arith.constant 0 : index
    %20 = tpu.strided_load %arg11[%c0_25, %c0_26, %c0_27] {strides = array<i32: 2, 2, 1>} : memref<18x18x4xf32, #tpu.memory_space<vmem>>, vector<8x8x4xf32>
    %21 = vector.shape_cast %20 : vector<8x8x4xf32> to vector<64x4xf32>
    %22 = arith.truncf %21 : vector<64x4xf32> to vector<64x4xbf16>
    %c0_28 = arith.constant 0 : index
    %c0_29 = arith.constant 0 : index
    %23 = vector.load %arg12[%c0_28, %c0_29] : memref<64x36xbf16, #tpu.memory_space<vmem>>, vector<64x4xbf16>
    tpu.vector_store %arg12[%c0_28, %c0_29], %22 {strides = array<i32>} : memref<64x36xbf16, #tpu.memory_space<vmem>>, vector<64x4xbf16>,
    %c0_30 = arith.constant 0 : index
    %c1_31 = arith.constant 1 : index
    %c0_32 = arith.constant 0 : index
    %24 = tpu.strided_load %arg11[%c0_30, %c1_31, %c0_32] {strides = array<i32: 2, 2, 1>} : memref<18x18x4xf32, #tpu.memory_space<vmem>>, vector<8x8x4xf32>
    %25 = vector.shape_cast %24 : vector<8x8x4xf32> to vector<64x4xf32>
    %26 = arith.truncf %25 : vector<64x4xf32> to vector<64x4xbf16>
    %c0_33 = arith.constant 0 : index
    %c4 = arith.constant 4 : index
    %27 = vector.load %arg12[%c0_33, %c4] : memref<64x36xbf16, #tpu.memory_space<vmem>>, vector<64x4xbf16>
    tpu.vector_store %arg12[%c0_33, %c4], %26 {strides = array<i32>} : memref<64x36xbf16, #tpu.memory_space<vmem>>, vector<64x4xbf16>,
    %c0_34 = arith.constant 0 : index
    %c2 = arith.constant 2 : index
    %c0_35 = arith.constant 0 : index
    %28 = tpu.strided_load %arg11[%c0_34, %c2, %c0_35] {strides = array<i32: 2, 2, 1>} : memref<18x18x4xf32, #tpu.memory_space<vmem>>, vector<8x8x4xf32>
    %29 = vector.shape_cast %28 : vector<8x8x4xf32> to vector<64x4xf32>
    %30 = arith.truncf %29 : vector<64x4xf32> to vector<64x4xbf16>
    %c0_36 = arith.constant 0 : index
    %c8 = arith.constant 8 : index
    %31 = vector.load %arg12[%c0_36, %c8] : memref<64x36xbf16, #tpu.memory_space<vmem>>, vector<64x4xbf16>
    tpu.vector_store %arg12[%c0_36, %c8], %30 {strides = array<i32>} : memref<64x36xbf16, #tpu.memory_space<vmem>>, vector<64x4xbf16>,
    %c1_37 = arith.constant 1 : index
    %c0_38 = arith.constant 0 : index
    %c0_39 = arith.constant 0 : index
    %32 = tpu.strided_load %arg11[%c1_37, %c0_38, %c0_39] {strides = array<i32: 2, 2, 1>} : memref<18x18x4xf32, #tpu.memory_space<vmem>>, vector<8x8x4xf32>
    %33 = vector.shape_cast %32 : vector<8x8x4xf32> to vector<64x4xf32>
    %34 = arith.truncf %33 : vector<64x4xf32> to vector<64x4xbf16>
    %c0_40 = arith.constant 0 : index
    %c12 = arith.constant 12 : index
    %35 = vector.load %arg12[%c0_40, %c12] : memref<64x36xbf16, #tpu.memory_space<vmem>>, vector<64x4xbf16>
    tpu.vector_store %arg12[%c0_40, %c12], %34 {strides = array<i32>} : memref<64x36xbf16, #tpu.memory_space<vmem>>, vector<64x4xbf16>,
    %c1_41 = arith.constant 1 : index
    %c1_42 = arith.constant 1 : index
    %c0_43 = arith.constant 0 : index
    %36 = tpu.strided_load %arg11[%c1_41, %c1_42, %c0_43] {strides = array<i32: 2, 2, 1>} : memref<18x18x4xf32, #tpu.memory_space<vmem>>, vector<8x8x4xf32>
    %37 = vector.shape_cast %36 : vector<8x8x4xf32> to vector<64x4xf32>
    %38 = arith.truncf %37 : vector<64x4xf32> to vector<64x4xbf16>
    %c0_44 = arith.constant 0 : index
    %c16 = arith.constant 16 : index
    %39 = vector.load %arg12[%c0_44, %c16] : memref<64x36xbf16, #tpu.memory_space<vmem>>, vector<64x4xbf16>
    tpu.vector_store %arg12[%c0_44, %c16], %38 {strides = array<i32>} : memref<64x36xbf16, #tpu.memory_space<vmem>>, vector<64x4xbf16>,
    %c1_45 = arith.constant 1 : index
    %c2_46 = arith.constant 2 : index
    %c0_47 = arith.constant 0 : index
    %40 = tpu.strided_load %arg11[%c1_45, %c2_46, %c0_47] {strides = array<i32: 2, 2, 1>} : memref<18x18x4xf32, #tpu.memory_space<vmem>>, vector<8x8x4xf32>
    %41 = vector.shape_cast %40 : vector<8x8x4xf32> to vector<64x4xf32>
    %42 = arith.truncf %41 : vector<64x4xf32> to vector<64x4xbf16>
    %c0_48 = arith.constant 0 : index
    %c20 = arith.constant 20 : index
    %43 = vector.load %arg12[%c0_48, %c20] : memref<64x36xbf16, #tpu.memory_space<vmem>>, vector<64x4xbf16>
    tpu.vector_store %arg12[%c0_48, %c20], %42 {strides = array<i32>} : memref<64x36xbf16, #tpu.memory_space<vmem>>, vector<64x4xbf16>,
    %c2_49 = arith.constant 2 : index
    %c0_50 = arith.constant 0 : index
    %c0_51 = arith.constant 0 : index
    %44 = tpu.strided_load %arg11[%c2_49, %c0_50, %c0_51] {strides = array<i32: 2, 2, 1>} : memref<18x18x4xf32, #tpu.memory_space<vmem>>, vector<8x8x4xf32>
    %45 = vector.shape_cast %44 : vector<8x8x4xf32> to vector<64x4xf32>
    %46 = arith.truncf %45 : vector<64x4xf32> to vector<64x4xbf16>
    %c0_52 = arith.constant 0 : index
    %c24 = arith.constant 24 : index
    %47 = vector.load %arg12[%c0_52, %c24] : memref<64x36xbf16, #tpu.memory_space<vmem>>, vector<64x4xbf16>
    tpu.vector_store %arg12[%c0_52, %c24], %46 {strides = array<i32>} : memref<64x36xbf16, #tpu.memory_space<vmem>>, vector<64x4xbf16>,
    %c2_53 = arith.constant 2 : index
    %c1_54 = arith.constant 1 : index
    %c0_55 = arith.constant 0 : index
    %48 = tpu.strided_load %arg11[%c2_53, %c1_54, %c0_55] {strides = array<i32: 2, 2, 1>} : memref<18x18x4xf32, #tpu.memory_space<vmem>>, vector<8x8x4xf32>
    %49 = vector.shape_cast %48 : vector<8x8x4xf32> to vector<64x4xf32>
    %50 = arith.truncf %49 : vector<64x4xf32> to vector<64x4xbf16>
    %c0_56 = arith.constant 0 : index
    %c28 = arith.constant 28 : index
    %51 = vector.load %arg12[%c0_56, %c28] : memref<64x36xbf16, #tpu.memory_space<vmem>>, vector<64x4xbf16>
    tpu.vector_store %arg12[%c0_56, %c28], %50 {strides = array<i32>} : memref<64x36xbf16, #tpu.memory_space<vmem>>, vector<64x4xbf16>,
    %c2_57 = arith.constant 2 : index
    %c2_58 = arith.constant 2 : index
    %c0_59 = arith.constant 0 : index
    %52 = tpu.strided_load %arg11[%c2_57, %c2_58, %c0_59] {strides = array<i32: 2, 2, 1>} : memref<18x18x4xf32, #tpu.memory_space<vmem>>, vector<8x8x4xf32>
    %53 = vector.shape_cast %52 : vector<8x8x4xf32> to vector<64x4xf32>
    %54 = arith.truncf %53 : vector<64x4xf32> to vector<64x4xbf16>
    %c0_60 = arith.constant 0 : index
    %c32 = arith.constant 32 : index
    %55 = vector.load %arg12[%c0_60, %c32] : memref<64x36xbf16, #tpu.memory_space<vmem>>, vector<64x4xbf16>
    tpu.vector_store %arg12[%c0_60, %c32], %54 {strides = array<i32>} : memref<64x36xbf16, #tpu.memory_space<vmem>>, vector<64x4xbf16>,
    %c0_61 = arith.constant 0 : index
    %c0_62 = arith.constant 0 : index
    %56 = vector.load %arg12[%c0_61, %c0_62] : memref<64x36xbf16, #tpu.memory_space<vmem>>, vector<64x36xbf16>
    %c0_63 = arith.constant 0 : index
    %c0_64 = arith.constant 0 : index
    %57 = vector.load %arg4[%c0_63, %c0_64] : memref<36x4xbf16, #tpu.memory_space<vmem>>, vector<36x4xbf16>
    %cst_65 = arith.constant dense<0.000000e+00> : vector<64x4xf32>
    %58 = tpu.matmul %56, %57, %cst_65 {dimension_numbers = #tpu.dot_dimension_numbers<[1], [0], [0], [1], [0, 0, 1, 1], [], []>} : vector<64x36xbf16>, vector<36x4xbf16>, vector<64x4xf32> -> vector<64x4xf32>
    %c0_66 = arith.constant 0 : index
    %c0_67 = arith.constant 0 : index
    %59 = vector.load %arg5[%c0_66, %c0_67] : memref<1x4xf32, #tpu.memory_space<vmem>>, vector<1x4xf32>
    %60 = vector.broadcast %59 : vector<1x4xf32> to vector<64x4xf32>
    %61 = arith.addf %58, %60 : vector<64x4xf32>
    %cst_68 = arith.constant 0.000000e+00 : f32
    %62 = vector.broadcast %cst_68 : f32 to vector<64x4xf32>
    %63 = arith.maximumf %61, %62 : vector<64x4xf32>
    %64 = arith.truncf %63 : vector<64x4xf32> to vector<64x4xbf16>
    %c0_69 = arith.constant 0 : index
    %c0_70 = arith.constant 0 : index
    %65 = vector.load %arg6[%c0_69, %c0_70] : memref<4x16xbf16, #tpu.memory_space<vmem>>, vector<4x16xbf16>
    %cst_71 = arith.constant dense<0.000000e+00> : vector<64x16xf32>
    %66 = tpu.matmul %64, %65, %cst_71 {dimension_numbers = #tpu.dot_dimension_numbers<[1], [0], [0], [1], [0, 0, 1, 1], [], []>} : vector<64x4xbf16>, vector<4x16xbf16>, vector<64x16xf32> -> vector<64x16xf32>
    %c0_72 = arith.constant 0 : index
    %c0_73 = arith.constant 0 : index
    %67 = vector.load %arg7[%c0_72, %c0_73] : memref<1x16xf32, #tpu.memory_space<vmem>>, vector<1x16xf32>
    %68 = vector.broadcast %67 : vector<1x16xf32> to vector<64x16xf32>
    %69 = arith.addf %66, %68 : vector<64x16xf32>
    %c0_74 = arith.constant 0 : index
    %c0_75 = arith.constant 0 : index
    %c0_76 = arith.constant 0 : index
    %c0_77 = arith.constant 0 : index
    %70 = tpu.strided_load %arg1[%c0_74, %c0_75, %c0_76, %c0_77] {strides = array<i32: 1, 2, 2, 1>} : memref<1x16x16x4xf32, #tpu.memory_space<vmem>>, vector<1x8x8x4xf32>
    %71 = vector.shape_cast %70 : vector<1x8x8x4xf32> to vector<64x4xf32>
    %72 = arith.truncf %71 : vector<64x4xf32> to vector<64x4xbf16>
    %c0_78 = arith.constant 0 : index
    %c0_79 = arith.constant 0 : index
    %73 = vector.load %arg8[%c0_78, %c0_79] : memref<4x16xbf16, #tpu.memory_space<vmem>>, vector<4x16xbf16>
    %cst_80 = arith.constant dense<0.000000e+00> : vector<64x16xf32>
    %74 = tpu.matmul %72, %73, %cst_80 {dimension_numbers = #tpu.dot_dimension_numbers<[1], [0], [0], [1], [0, 0, 1, 1], [], []>} : vector<64x4xbf16>, vector<4x16xbf16>, vector<64x16xf32> -> vector<64x16xf32>
    %c0_81 = arith.constant 0 : index
    %c0_82 = arith.constant 0 : index
    %75 = vector.load %arg9[%c0_81, %c0_82] : memref<1x16xf32, #tpu.memory_space<vmem>>, vector<1x16xf32>
    %76 = vector.broadcast %75 : vector<1x16xf32> to vector<64x16xf32>
    %77 = arith.addf %74, %76 : vector<64x16xf32>
    %78 = arith.addf %69, %77 : vector<64x16xf32>
    %cst_83 = arith.constant 0.000000e+00 : f32
    %79 = vector.broadcast %cst_83 : f32 to vector<64x16xf32>
    %80 = arith.maximumf %78, %79 : vector<64x16xf32>
    %81 = vector.shape_cast %80 : vector<64x16xf32> to vector<1x8x8x16xf32>
    %c0_84 = arith.constant 0 : index
    %c0_85 = arith.constant 0 : index
    %c0_86 = arith.constant 0 : index
    %c0_87 = arith.constant 0 : index
    %82 = vector.load %arg10[%c0_84, %c0_85, %c0_86, %c0_87] : memref<1x8x8x16xf32, #tpu.memory_space<vmem>>, vector<1x8x8x16xf32>
    tpu.vector_store %arg10[%c0_84, %c0_85, %c0_86, %c0_87], %81 {strides = array<i32>} : memref<1x8x8x16xf32, #tpu.memory_space<vmem>>, vector<1x8x8x16xf32>,
    return
  }
  func.func @transform_0(%arg0: i32) -> (i32, i32, i32, i32) {
    %c0_i32 = arith.constant 0 : i32
    %c0_i32_0 = arith.constant 0 : i32
    %c0_i32_1 = arith.constant 0 : i32
    %c0_i32_2 = arith.constant 0 : i32
    return %arg0, %c0_i32, %c0_i32_0, %c0_i32_1 : i32, i32, i32, i32
  }
  func.func @transform_1(%arg0: i32) -> (i32, i32) {
    %c0_i32 = arith.constant 0 : i32
    %c0_i32_0 = arith.constant 0 : i32
    %c0_i32_1 = arith.constant 0 : i32
    return %c0_i32, %c0_i32_0 : i32, i32
  }
  func.func @transform_2(%arg0: i32) -> (i32, i32) {
    %c0_i32 = arith.constant 0 : i32
    %c0_i32_0 = arith.constant 0 : i32
    %c0_i32_1 = arith.constant 0 : i32
    return %c0_i32, %c0_i32_0 : i32, i32
  }
  func.func @transform_3(%arg0: i32) -> (i32, i32) {
    %c0_i32 = arith.constant 0 : i32
    %c0_i32_0 = arith.constant 0 : i32
    %c0_i32_1 = arith.constant 0 : i32
    return %c0_i32, %c0_i32_0 : i32, i32
  }
  func.func @transform_4(%arg0: i32) -> (i32, i32) {
    %c0_i32 = arith.constant 0 : i32
    %c0_i32_0 = arith.constant 0 : i32
    %c0_i32_1 = arith.constant 0 : i32
    return %c0_i32, %c0_i32_0 : i32, i32
  }
  func.func @transform_5(%arg0: i32) -> (i32, i32) {
    %c0_i32 = arith.constant 0 : i32
    %c0_i32_0 = arith.constant 0 : i32
    %c0_i32_1 = arith.constant 0 : i32
    return %c0_i32, %c0_i32_0 : i32, i32
  }
  func.func @transform_6(%arg0: i32) -> (i32, i32) {
    %c0_i32 = arith.constant 0 : i32
    %c0_i32_0 = arith.constant 0 : i32
    %c0_i32_1 = arith.constant 0 : i32
    return %c0_i32, %c0_i32_0 : i32, i32
  }
  func.func @transform_7(%arg0: i32) -> (i32, i32) {
    %c0_i32 = arith.constant 0 : i32
    %c0_i32_0 = arith.constant 0 : i32
    %c0_i32_1 = arith.constant 0 : i32
    return %c0_i32, %c0_i32_0 : i32, i32
  }
  func.func @transform_8(%arg0: i32) -> (i32, i32) {
    %c0_i32 = arith.constant 0 : i32
    %c0_i32_0 = arith.constant 0 : i32
    %c0_i32_1 = arith.constant 0 : i32
    return %c0_i32, %c0_i32_0 : i32, i32
  }
  func.func @transform_9(%arg0: i32) -> (i32, i32, i32, i32) {
    %c0_i32 = arith.constant 0 : i32
    %c0_i32_0 = arith.constant 0 : i32
    %c0_i32_1 = arith.constant 0 : i32
    %c0_i32_2 = arith.constant 0 : i32
    return %arg0, %c0_i32, %c0_i32_0, %c0_i32_1 : i32, i32, i32, i32
  }
}

</mosaic_0001>

<bundles_post_ra>
// kernel: tpu_custom_call.1
= control target key start
LH: loop header
LB: loop body
LE: loop exit
PB: predicated region body
PF: predicated region fallthrough
CT: control target
= control target key end

     0   :  { %14 = vsyncpa [#allocation5], 0  ;;  %s2268_s0 = inlined_call_operand.vmem [shape: f32[2,16,16,4], index: 0, kind: input, shape index: {}]   ;;  %s2269_s1 = inlined_call_operand.vmem [shape: bf16[4,4], index: 1, kind: input, shape index: {}]   ;;  %s2270_s2 = inlined_call_operand.vmem [shape: f32[1,4], index: 2, kind: input, shape index: {}]   ;;  %s2271_s3 = inlined_call_operand.vmem [shape: bf16[36,4], index: 3, kind: input, shape index: {}]   ;;  %s2272_s4 = inlined_call_operand.vmem [shape: f32[1,4], index: 4, kind: input, shape index: {}]   ;;  %s2273_s5 = inlined_call_operand.vmem [shape: bf16[4,16], index: 5, kind: input, shape index: {}]   ;;  %s2274_s6 = inlined_call_operand.vmem [shape: f32[1,16], index: 6, kind: input, shape index: {}]   ;;  %s2275_s7 = inlined_call_operand.vmem [shape: bf16[4,16], index: 7, kind: input, shape index: {}]   ;;  %s2276_s8 = inlined_call_operand.vmem [shape: f32[1,16], index: 8, kind: input, shape index: {}]   ;;  %s2277_s9 = inlined_call_operand.hbm [shape: f32[2,8,8,16], index: 9, kind: output, shape index: {}]  }
   0x1   :  { %16 = vsyncpa [#allocation5 + $0x1], 0  ;;  %s1891_s30 = smov 0   ;;  %s1893_s10 = smov 0  }
   0x2   :  { %s1895_s11 = smov 0   ;;  %s1897_s12 = smov 0  }
   0x3 LB: > { %s1912_s13 = sadd.s32 4294967295, %s1828_s12   ;;  %s1528_s14 = sadd.s32 4294967294, %s1828_s12   ;;  %s1828_s12 = sphi %s1897_s12, %s2286_s12   ;;  %s1824_s11 = sphi %s1895_s11, %s2285_s11   ;;  %s1820_s10 = sphi %s1893_s10, %s2284_s10   ;;  %s1816_s30 = sphi %s1891_s30, %s2283_s30  }
   0x4   : > { %s1916_s15 = sadd.s32 1, %s1828_s12   ;;  %s223_s16 = sadd.s32 1, %s1824_s11 }
   0x5   : > { %s220_s17 = ssub.s32 %s1828_s12, %s1916_s15  ;;  %p233_p0 = scmp.ne.s32.totalorder %s1824_s11, %s1820_s10 }
   0x6   : > { %p221_p1 = scmp.eq.s32.totalorder %s220_s17, 0  ;;  %p234_p2 = scmp.eq.s32.totalorder %s1912_s13, 1 }
   0x7   : > { %p239_p3 = scmp.ne.s32.totalorder %s1820_s10, %s1816_s30  ;;  %p240_p4 = scmp.eq.s32.totalorder %s1528_s14, 1 }
   0x8   : > { %s1927_s18 = scalar_select %p221_p1, %s1824_s11, %s223_s16  }
   0x9   : > { %p1929_p5 = por %p234_p2, %p233_p0  ;;  %p1933_p6 = por %p240_p4, %p239_p3 }
   0xa   : > { %p1531_p7 = scmp.ge.s32.totalorder %s1828_s12, 1  ;;  %p290_p8 = scmp.lt.s32.totalorder %s1828_s12, 3 }
   0xc   : > { %p291_p9 = pnand %p1531_p7, %p290_p8 }
   0xd   : > { %v380_v0 = vld [vmem:[%s2269_s1] sm:$0x3] (!%p291_p9)  ;;  %vm437_vm0 = vcmask (!%p291_p9), 1041408   ;;  %p326_p10 = scmp.lt.s32.totalorder (!%p291_p9), %s1912_s13, 1  ;;  %vm388_vm1 = vcmask (!%p291_p9), 31744   ;;  %v1830_v50 = vmov (!%p291_p9), 0.0  }
   0xe   : > { %294 = sbr.rel (%p291_p9) target bundleno = 928 (0x3a0), region = 56  ;;  %1710 = vmatprep.subr.msk.bf16.mxu0 (!%p291_p9), %vm437_vm0, %v380_v0  ;;  %v439_v1 = vsel (!%p291_p9), %vm437_vm0, %v380_v0, 0  ;;  %634 = vst.msk [vmem:[#allocation2] sm:$0xff] (!%p291_p9), %vm388_vm1, %v1830_v50  ;;  %635 = vst.msk [vmem:[#allocation2 + $0x8] sm:$0xff] (!%p291_p9), %vm388_vm1, %v1830_v50  ;;  %vm636_vm2 = vcmask (!%p291_p9), 25600   ;;  %vm642_vm3 = vcmask (!%p291_p9), 24576  }
   0xf   : > { %1619 = vmatpush3.bf16.msra.mxu0 (!%p291_p9), %v439_v1  ;;  %637 = vst.msk [vmem:[#allocation2 + $0x10] sm:$0x3] (!%p291_p9), %vm636_vm2, %v1830_v50  ;;  %v2021_v51 = vld [vmem:[%s2270_s2] ss:$0 sm:$0xff] (!%p291_p9)  ;;  %s1831_s14 = smov (!%p291_p9), 8   ;;  %s1832_s16 = smov (!%p291_p9), 4  }
  0x10   : > { %643 = vst.msk [vmem:[#allocation2] sm:$0x1] (!%p291_p9), %vm642_vm3, %v1830_v50  ;;  %644 = vst.msk [vmem:[#allocation2 + $0x18] sm:$0x1] (!%p291_p9), %vm642_vm3, %v1830_v50  ;;  %s1833_s17 = smov (!%p291_p9), 24   ;;  %s2278_s21 = smov (!%p291_p9), 28  }
  0x11   : > { %645 = vst.msk [vmem:[#allocation2 + $0x30] sm:$0x1] (!%p291_p9), %vm642_vm3, %v1830_v50  ;;  %646 = vst.msk [vmem:[#allocation2 + $0x48] sm:$0x1] (!%p291_p9), %vm642_vm3, %v1830_v50  ;;  %s1835_s22 = smov (!%p291_p9), 32   ;;  %s1837_s26 = smov (!%p291_p9), 16  }
  0x12   : > { %647 = vst.msk [vmem:[#allocation2 + $0x60] sm:$0x1] (!%p291_p9), %vm642_vm3, %v1830_v50  ;;  %648 = vst.msk [vmem:[#allocation2 + $0x78] sm:$0x1] (!%p291_p9), %vm642_vm3, %v1830_v50  ;;  %s1838_s28 = smov (!%p291_p9), 20   ;;  %vm771_vm4 = vcmask (!%p291_p9), 64544  }
  0x13   : > { %649 = vst.msk [vmem:[#allocation2 + $0x90] sm:$0x1] (!%p291_p9), %vm642_vm3, %v1830_v50  ;;  %650 = vst.msk [vmem:[#allocation2 + $0xa8] sm:$0x1] (!%p291_p9), %vm642_vm3, %v1830_v50  ;;  %vm812_vm5 = vcmask (!%p291_p9), 97344   ;;  %vm852_vm6 = vcmask (!%p291_p9), 130144  }
  0x14   : > { %651 = vst.msk [vmem:[#allocation2 + $0xc0] sm:$0x1] (!%p291_p9), %vm642_vm3, %v1830_v50  ;;  %652 = vst.msk [vmem:[#allocation2 + $0xd8] sm:$0x1] (!%p291_p9), %vm642_vm3, %v1830_v50  ;;  %vm893_vm7 = vcmask (!%p291_p9), 162944   ;;  %vm934_vm8 = vcmask (!%p291_p9), 195744  }
  0x15   : > { %s327_s23 = scalar_select %p326_p10, %s1912_s13, 1  ;;  %653 = vst.msk [vmem:[#allocation2 + $0xf0] sm:$0x1] %vm642_vm3, %v1830_v50  ;;  %654 = vst.msk [vmem:[#allocation2 + $0x108] sm:$0x1] %vm642_vm3, %v1830_v50  ;;  %vm975_vm9 = vcmask 228544  }
  0x16   : > { %655 = vst.msk [vmem:[#allocation2 + $0x120] sm:$0x1] %vm642_vm3, %v1830_v50  ;;  %656 = vst.msk [vmem:[#allocation2 + $0x138] sm:$0x1] %vm642_vm3, %v1830_v50  ;;  %vm1016_vm10 = vcmask 261344   ;;  %vm1057_vm11 = vcmask 294144  }
  0x17   : > { %s1582_s24 = sshll.u32 %s327_s23, 8  ;;  %657 = vst.msk [vmem:[#allocation2 + $0x150] sm:$0x1] %vm642_vm3, %v1830_v50  ;;  %658 = vst.msk [vmem:[#allocation2 + $0x168] sm:$0x1] %vm642_vm3, %v1830_v50  ;;  %s1836_s23 = smov 12  }
  0x18   : > { %s1949_s27 = scalar_lea.vmem %s2268_s0, %s1582_s24  ;;  %659 = vst.msk [vmem:[#allocation2 + $0x180] sm:$0x1] %vm642_vm3, %v1830_v50  ;;  %vm1093_vm12 = vcmask 293888   ;;  %vm1397_vm13 = vcmask 130048   ;;  %s1839_s25 = smov [#allocation4]  }
  0x19   : > { %v332_v2 = vld [vmem:[%s1949_s27] sm:$0xff]  ;;  %v333_v3 = vld [vmem:[%s1949_s27 + $0x8] sm:$0xff]  ;;  %v334_v4 = vld [vmem:[%s1949_s27 + $0x10] sm:$0xff] }
  0x1a   : > { %v364_v5 = vpack.c.bf16 %v333_v3, %v332_v2  ;;  %v335_v6 = vld [vmem:[%s1949_s27 + $0x18] sm:$0xff]  ;;  %v336_v7 = vld [vmem:[%s1949_s27 + $0x20] sm:$0xff]  ;;  %v337_v8 = vld [vmem:[%s1949_s27 + $0x28] sm:$0xff] }
  0x1b   : > { %v365_v9 = vpack.c.bf16 %v335_v6, %v334_v4  ;;  %v366_v10 = vpack.c.bf16 %v337_v8, %v336_v7  ;;  %v338_v11 = vld [vmem:[%s1949_s27 + $0x30] sm:$0xff]  ;;  %v339_v12 = vld [vmem:[%s1949_s27 + $0x38] sm:$0xff]  ;;  %v340_v13 = vld [vmem:[%s1949_s27 + $0x40] sm:$0xff] }
  0x1c   : > { %1620 = vmatprep.mubr.msk.bf16.mxu0 %vm388_vm1, %v364_v5  ;;  %v341_v14 = vld [vmem:[%s1949_s27 + $0x48] sm:$0xff]  ;;  %v367_v15 = vpack.c.bf16 %v339_v12, %v338_v11  ;;  %v342_v17 = vld [vmem:[%s1949_s27 + $0x50] sm:$0xff]  ;;  %v343_v18 = vld [vmem:[%s1949_s27 + $0x58] sm:$0xff] }
  0x1d   : > { %1621 = vmatmul.mubr.msk.bf16.vlgmr.msra.gmra.mrb[0].mxu0 %vm388_vm1, %v365_v9  ;;  %v368_v16 = vpack.c.bf16 %v341_v14, %v340_v13  ;;  %v344_v19 = vld [vmem:[%s1949_s27 + $0x60] sm:$0xff]  ;;  %v345_v20 = vld [vmem:[%s1949_s27 + $0x68] sm:$0xff]  ;;  %v369_v21 = vpack.c.bf16 %v343_v18, %v342_v17  ;;  %v346_v23 = vld [vmem:[%s1949_s27 + $0x70] sm:$0xff] }
  0x1e   : > { %1624 = vmatprep.mubr.msk.bf16.mxu0 %vm388_vm1, %v366_v10  ;;  %v370_v22 = vpack.c.bf16 %v345_v20, %v344_v19  ;;  %v347_v24 = vld [vmem:[%s1949_s27 + $0x78] sm:$0xff]  ;;  %v348_v25 = vld [vmem:[%s1949_s27 + $0x80] sm:$0xff]  ;;  %v349_v26 = vld [vmem:[%s1949_s27 + $0x88] sm:$0xff] }
  0x1f   : > { %v371_v27 = vpack.c.bf16 %v347_v24, %v346_v23  ;;  %v372_v28 = vpack.c.bf16 %v349_v26, %v348_v25  ;;  %v350_v29 = vld [vmem:[%s1949_s27 + $0x90] sm:$0xff]  ;;  %v351_v30 = vld [vmem:[%s1949_s27 + $0x98] sm:$0xff]  ;;  %v352_v31 = vld [vmem:[%s1949_s27 + $0xa0] sm:$0xff] }
  0x20   : > { %v353_v32 = vld [vmem:[%s1949_s27 + $0xa8] sm:$0xff]  ;;  %v373_v33 = vpack.c.bf16 %v351_v30, %v350_v29  ;;  %v354_v35 = vld [vmem:[%s1949_s27 + $0xb0] sm:$0xff]  ;;  %v355_v36 = vld [vmem:[%s1949_s27 + $0xb8] sm:$0xff] }
  0x21   : > { %v374_v34 = vpack.c.bf16 %v353_v32, %v352_v31  ;;  %v356_v37 = vld [vmem:[%s1949_s27 + $0xc0] sm:$0xff]  ;;  %v357_v38 = vld [vmem:[%s1949_s27 + $0xc8] sm:$0xff]  ;;  %v375_v39 = vpack.c.bf16 %v355_v36, %v354_v35  ;;  %v358_v41 = vld [vmem:[%s1949_s27 + $0xd0] sm:$0xff] }
  0x22   : > { %v376_v40 = vpack.c.bf16 %v357_v38, %v356_v37  ;;  %v359_v42 = vld [vmem:[%s1949_s27 + $0xd8] sm:$0xff]  ;;  %v360_v43 = vld [vmem:[%s1949_s27 + $0xe0] sm:$0xff]  ;;  %v361_v44 = vld [vmem:[%s1949_s27 + $0xe8] sm:$0xff] }
  0x23   : > { %v377_v45 = vpack.c.bf16 %v359_v42, %v358_v41  ;;  %v378_v46 = vpack.c.bf16 %v361_v44, %v360_v43  ;;  %v362_v47 = vld [vmem:[%s1949_s27 + $0xf0] sm:$0xff]  ;;  %v363_v48 = vld [vmem:[%s1949_s27 + $0xf8] sm:$0xff]  ;;  %v736_v11 = vld [vmem:[#allocation2 + $0x1] ss:$2 sm:$0xff] }
  0x24   : > { %v379_v49 = vpack.c.bf16 %v363_v48, %v362_v47  ;;  %v777_v10 = vld [vmem:[#allocation2 + $0x2] ss:$2 sm:$0xff] }
  0x25   : > { %1625 = vmatmul.mubr.msk.bf16.gmra.mrb[4].mxu0 %vm388_vm1, %v367_v15  ;;  %v712_v18 = vld [vmem:[#allocation2] ss:$2 sm:$0xff] }
  0x26   : > { %1628 = vmatprep.mubr.msk.bf16.mxu0 %vm388_vm1, %v368_v16 }
  0x2d   : > { %1629 = vmatmul.mubr.msk.bf16.gmra.mrb[8].mxu0 %vm388_vm1, %v369_v21 }
  0x2e   : > { %1632 = vmatprep.mubr.msk.bf16.mxu0 %vm388_vm1, %v370_v22 }
  0x35   : > { %1633 = vmatmul.mubr.msk.bf16.gmra.mrb[12].mxu0 %vm388_vm1, %v371_v27 }
  0x36   : > { %1636 = vmatprep.mubr.msk.bf16.mxu0 %vm388_vm1, %v372_v28 }
  0x3d   : > { %1637 = vmatmul.mubr.msk.bf16.gmra.mrb[16].mxu0 %vm388_vm1, %v373_v33 }
  0x3e   : > { %1640 = vmatprep.mubr.msk.bf16.mxu0 %vm388_vm1, %v374_v34 }
  0x45   : > { %1641 = vmatmul.mubr.msk.bf16.gmra.mrb[20].mxu0 %vm388_vm1, %v375_v39 }
  0x46   : > { %1644 = vmatprep.mubr.msk.bf16.mxu0 %vm388_vm1, %v376_v40 }
  0x4d   : > { %1645 = vmatmul.mubr.msk.bf16.gmra.mrb[24].mxu0 %vm388_vm1, %v377_v45 }
  0x4e   : > { %1648 = vmatprep.mubr.msk.bf16.mxu0 %vm388_vm1, %v378_v46 }
  0x55   : > { %1649 = vmatmul.mubr.msk.bf16.gmra.mrb[28].mxu0 %vm388_vm1, %v379_v49 }
  0xf0   : > { %v1622_v52 = vpop.f32.mrb[0].mxu0 }
  0xf1   : > { %v484_v53 = vadd.f32 %v1622_v52, %v2021_v51  ;;  %v475_v54 = vpop.f32.mrb[1].mxu0 }
  0xf2   : > { %v476_v55 = vadd.f32 %v2021_v51, %v475_v54  ;;  %v1623_v56 = vpop.f32.mrb[2].mxu0 }
  0xf3   : > { %v604_v57 = vmax.f32 %v484_v53, 0.0  ;;  %v487_v58 = vadd.f32 %v1623_v56, %v2021_v51  ;;  %v478_v59 = vpop.f32.mrb[3].mxu0 }
  0xf4   : > { %v602_v60 = vmax.f32 %v476_v55, 0.0  ;;  %v479_v61 = vadd.f32 %v2021_v51, %v478_v59 }
  0xf5   : > { %682 = vst.msk [vmem:[#allocation2 + $0x31] sm:$0xff] %vm388_vm1, %v604_v57  ;;  %v605_v62 = vmax.f32 %v487_v58, 0.0 }
  0xf6   : > { %680 = vst.msk [vmem:[#allocation2 + $0x19] sm:$0xff] %vm388_vm1, %v602_v60  ;;  %v603_v63 = vmax.f32 %v479_v61, 0.0 }
  0xf7   : > { %683 = vst.msk [vmem:[#allocation2 + $0x39] sm:$0xff] %vm388_vm1, %v605_v62 }
  0xf8   : > { %681 = vst.msk [vmem:[#allocation2 + $0x21] sm:$0xff] %vm388_vm1, %v603_v63  ;;  %v1626_v0 = vpop.f32.mrb[4].mxu0 }
  0xf9   : > { %v500_v1 = vadd.f32 %v1626_v0, %v2021_v51  ;;  %v491_v2 = vpop.f32.mrb[5].mxu0 }
  0xfa   : > { %v492_v3 = vadd.f32 %v2021_v51, %v491_v2  ;;  %v1627_v4 = vpop.f32.mrb[6].mxu0 }
  0xfb   : > { %v608_v5 = vmax.f32 %v500_v1, 0.0  ;;  %v503_v6 = vadd.f32 %v1627_v4, %v2021_v51  ;;  %v494_v7 = vpop.f32.mrb[7].mxu0 }
  0xfc   : > { %v606_v8 = vmax.f32 %v492_v3, 0.0  ;;  %v495_v9 = vadd.f32 %v2021_v51, %v494_v7 }
  0xfd   : > { %686 = vst.msk [vmem:[#allocation2 + $0x61] sm:$0xff] %vm388_vm1, %v608_v5  ;;  %v609_v12 = vmax.f32 %v503_v6, 0.0 }
  0xfe   : > { %684 = vst.msk [vmem:[#allocation2 + $0x49] sm:$0xff] %vm388_vm1, %v606_v8  ;;  %v607_v13 = vmax.f32 %v495_v9, 0.0  ;;  %v779_v14 = vld [vmem:[#allocation2 + $0x32] ss:$2 sm:$0xff]  ;;  %v738_v15 = vld [vmem:[#allocation2 + $0x31] ss:$2 sm:$0xff] }
  0xff   : > { %687 = vst.msk [vmem:[#allocation2 + $0x69] sm:$0xff] %vm388_vm1, %v609_v12  ;;  %v792_v16 = vpack.c.bf16 %v779_v14, %v777_v10  ;;  %v751_v17 = vpack.c.bf16 %v738_v15, %v736_v11  ;;  %v714_v22 = vld [vmem:[#allocation2 + $0x30] ss:$2 sm:$0xff]  ;;  %v981_v42 = vld [vmem:[#allocation2 + $0x31] ss:$2 sm:$0xff] }
 0x100   : > { %685 = vst.msk [vmem:[#allocation2 + $0x51] sm:$0xff] %vm388_vm1, %v607_v13  ;;  %v1630_v19 = vpop.f32.mrb[8].mxu0  ;;  %v727_v25 = vpack.c.bf16 %v714_v22, %v712_v18  ;;  %v940_v33 = vld [vmem:[#allocation2 + $0x30] ss:$2 sm:$0xff]  ;;  %v858_v12 = vld [vmem:[#allocation2 + $0x19] ss:$2 sm:$0xff] }
 0x101   : > { %v516_v20 = vadd.f32 %v1630_v19, %v2021_v51  ;;  %800 = vrot.lane.b32.xlu1 %v792_v16, %s1831_s14  ;;  %759 = vrot.lane.b32.xlu0 %v751_v17, %s1832_s16  ;;  %v507_v21 = vpop.f32.mrb[9].mxu0  ;;  %v1022_v52 = vld [vmem:[#allocation2 + $0x32] ss:$2 sm:$0xff] }
 0x102   : > { %v508_v23 = vadd.f32 %v2021_v51, %v507_v21  ;;  %v1631_v24 = vpop.f32.mrb[10].mxu0  ;;  %731 = vst.msk [vmem:[#allocation3] sm:$0xff] %vm388_vm1, %v727_v25  ;;  %v817_v62 = vld [vmem:[#allocation2 + $0x18] ss:$2 sm:$0xff] }
 0x103   : > { %v612_v26 = vmax.f32 %v516_v20, 0.0  ;;  %v519_v27 = vadd.f32 %v1631_v24, %v2021_v51  ;;  %v510_v28 = vpop.f32.mrb[11].mxu0  ;;  %v1763_v21 = vld [vmem:[%s2271_s3] sm:$0xff]  }
 0x104   : > { %v610_v29 = vmax.f32 %v508_v23, 0.0  ;;  %v511_v30 = vadd.f32 %v2021_v51, %v510_v28  ;;  %1652 = vmatprep.subr.bf16.mxu1 %v1763_v21 }
 0x105   : > { %690 = vst.msk [vmem:[#allocation2 + $0x91] sm:$0xff] %vm388_vm1, %v612_v26  ;;  %v613_v31 = vmax.f32 %v519_v27, 0.0  ;;  %v899_v27 = vld [vmem:[#allocation2 + $0x1a] ss:$2 sm:$0xff]  ;;  %1653 = vmatpush3.bf16.msra.mxu1 %v1763_v21 }
 0x106   : > { %688 = vst.msk [vmem:[#allocation2 + $0x79] sm:$0xff] %vm388_vm1, %v610_v29  ;;  %v611_v32 = vmax.f32 %v511_v30, 0.0  ;;  %v942_v34 = vld [vmem:[#allocation2 + $0x60] ss:$2 sm:$0xff]  ;;  %v983_v37 = vld [vmem:[#allocation2 + $0x61] ss:$2 sm:$0xff] }
 0x107   : > { %691 = vst.msk [vmem:[#allocation2 + $0x99] sm:$0xff] %vm388_vm1, %v613_v31  ;;  %v955_v35 = vpack.c.bf16 %v942_v34, %v940_v33  ;;  %v996_v46 = vpack.c.bf16 %v983_v37, %v981_v42  ;;  %v1024_v49 = vld [vmem:[#allocation2 + $0x62] ss:$2 sm:$0xff]  ;;  %v860_v10 = vld [vmem:[#allocation2 + $0x49] ss:$2 sm:$0xff] }
 0x108   : > { %689 = vst.msk [vmem:[#allocation2 + $0x81] sm:$0xff] %vm388_vm1, %v611_v32  ;;  %v1634_v36 = vpop.f32.mrb[12].mxu0  ;;  %v781_v54 = vld [vmem:[#allocation2 + $0x62] ss:$2 sm:$0xff]  ;;  %v1037_v56 = vpack.c.bf16 %v1024_v49, %v1022_v52  ;;  %v873_v17 = vpack.c.bf16 %v860_v10, %v858_v12 }
 0x109   : > { %v532_v38 = vadd.f32 %v1634_v36, %v2021_v51  ;;  %963 = vrot.lane.b32.xlu0 %v955_v35, %s1833_s17  ;;  %v523_v39 = vpop.f32.mrb[13].mxu0  ;;  %v819_v59 = vld [vmem:[#allocation2 + $0x48] ss:$2 sm:$0xff] }
 0x10a   : > { %v524_v40 = vadd.f32 %v2021_v51, %v523_v39  ;;  %v1635_v41 = vpop.f32.mrb[14].mxu0  ;;  %v716_v1 = vld [vmem:[#allocation2 + $0x60] ss:$2 sm:$0xff]  ;;  %v832_v6 = vpack.c.bf16 %v819_v59, %v817_v62 }
 0x10b   : > { %v616_v43 = vmax.f32 %v532_v38, 0.0  ;;  %v535_v44 = vadd.f32 %v1635_v41, %v2021_v51  ;;  %v526_v45 = vpop.f32.mrb[15].mxu0  ;;  %v901_v20 = vld [vmem:[#allocation2 + $0x4a] ss:$2 sm:$0xff] }
 0x10c   : > { %v614_v47 = vmax.f32 %v524_v40, 0.0  ;;  %v527_v48 = vadd.f32 %v2021_v51, %v526_v45  ;;  %v914_v32 = vpack.c.bf16 %v901_v20, %v899_v27  ;;  %v740_v40 = vld [vmem:[#allocation2 + $0x61] ss:$2 sm:$0xff] }
 0x10d   : > { %694 = vst.msk [vmem:[#allocation2 + $0xc1] sm:$0xff] %vm388_vm1, %v616_v43  ;;  %v617_v50 = vmax.f32 %v535_v44, 0.0  ;;  %1004 = vrot.lane.b32.xlu0 %v996_v46, %s2278_s21 }
 0x10e   : > { %692 = vst.msk [vmem:[#allocation2 + $0xa9] sm:$0xff] %vm388_vm1, %v614_v47  ;;  %v615_v53 = vmax.f32 %v527_v48, 0.0  ;;  %v783_v55 = vld [vmem:[#allocation2 + $0x92] ss:$2 sm:$0xff]  ;;  %v985_v26 = vld [vmem:[#allocation2 + $0x91] ss:$2 sm:$0xff] }
 0x10f   : > { %695 = vst.msk [vmem:[#allocation2 + $0xc9] sm:$0xff] %vm388_vm1, %v617_v50  ;;  %v793_v57 = vpack.c.bf16 %v783_v55, %v781_v54  ;;  %v718_v2 = vld [vmem:[#allocation2 + $0x90] ss:$2 sm:$0xff]  ;;  %v742_v36 = vld [vmem:[#allocation2 + $0x91] ss:$2 sm:$0xff]  ;;  %v1764_v47 = vld [vmem:[%s2271_s3 + $0x8] sm:$0xff]  }
 0x110   : > { %693 = vst.msk [vmem:[#allocation2 + $0xb1] sm:$0xff] %vm388_vm1, %v615_v53  ;;  %v1638_v58 = vpop.f32.mrb[16].mxu0  ;;  %v728_v7 = vpack.c.bf16 %v718_v2, %v716_v1  ;;  %v944_v14 = vld [vmem:[#allocation2 + $0x90] ss:$2 sm:$0xff]  ;;  %v752_v42 = vpack.c.bf16 %v742_v36, %v740_v40  ;;  %v862_v44 = vld [vmem:[#allocation2 + $0x79] ss:$2 sm:$0xff]  ;;  %1654 = vmatprep.subr.bf16.mxu1 %v1764_v47 }
 0x111   : > { %v548_v60 = vadd.f32 %v1638_v58, %v2021_v51  ;;  %1045 = vrot.lane.b32.xlu0 %v1037_v56, %s1835_s22  ;;  %802 = vrot.lane.b32.xlu1 %v793_v57, %s1831_s14  ;;  %v539_v61 = vpop.f32.mrb[17].mxu0  ;;  %v821_v39 = vld [vmem:[#allocation2 + $0x78] ss:$2 sm:$0xff]  ;;  %v1765_v57 = vld [vmem:[%s2271_s3 + $0x10] ss:$0 sps:$4 sm:$0x33]  }
 0x112   : > { %v540_v63 = vadd.f32 %v2021_v51, %v539_v61  ;;  %v1639_v0 = vpop.f32.mrb[18].mxu0  ;;  %732 = vst.msk [vmem:[#allocation3 + $0x8] sm:$0xff] %vm388_vm1, %v728_v7  ;;  %v1026_v55 = vld [vmem:[#allocation2 + $0x92] ss:$2 sm:$0xff]  ;;  %1655 = vmatpush3.bf16.msra.mxu1 %v1764_v47 }
 0x113   : > { %v620_v3 = vmax.f32 %v548_v60, 0.0  ;;  %v551_v4 = vadd.f32 %v1639_v0, %v2021_v51  ;;  %v542_v5 = vpop.f32.mrb[19].mxu0  ;;  %1711 = vmatprep.subr.msk.bf16.mxu1 %vm437_vm0, %v1765_v57 }
 0x114   : > { %v618_v8 = vmax.f32 %v540_v63, 0.0  ;;  %v543_v9 = vadd.f32 %v2021_v51, %v542_v5 }
 0x115   : > { %698 = vst.msk [vmem:[#allocation2 + $0xf1] sm:$0xff] %vm388_vm1, %v620_v3  ;;  %v621_v11 = vmax.f32 %v551_v4, 0.0  ;;  %840 = vrot.lane.b32.xlu0 %v832_v6, %s1836_s23  ;;  %v1107_v3 = vsel %vm437_vm0, %v1765_v57, 0  ;;  %v903_v6 = vld [vmem:[#allocation2 + $0x7a] ss:$2 sm:$0xff] }
 0x116   : > { %696 = vst.msk [vmem:[#allocation2 + $0xd9] sm:$0xff] %vm388_vm1, %v618_v8  ;;  %v619_v13 = vmax.f32 %v543_v9, 0.0  ;;  %v946_v15 = vld [vmem:[#allocation2 + $0xc0] ss:$2 sm:$0xff]  ;;  %v987_v19 = vld [vmem:[#allocation2 + $0xc1] ss:$2 sm:$0xff]  ;;  %1657 = vmatpush3.bf16.msra.mxu1 %v1107_v3 }
 0x117   : > { %699 = vst.msk [vmem:[#allocation2 + $0xf9] sm:$0xff] %vm388_vm1, %v621_v11  ;;  %v956_v16 = vpack.c.bf16 %v946_v15, %v944_v14  ;;  %v997_v31 = vpack.c.bf16 %v987_v19, %v985_v26  ;;  %v823_v35 = vld [vmem:[#allocation2 + $0xa8] ss:$2 sm:$0xff]  ;;  %v864_v45 = vld [vmem:[#allocation2 + $0xa9] ss:$2 sm:$0xff] }
 0x118   : > { %697 = vst.msk [vmem:[#allocation2 + $0xe1] sm:$0xff] %vm388_vm1, %v619_v13  ;;  %v1642_v18 = vpop.f32.mrb[20].mxu0  ;;  %v833_v41 = vpack.c.bf16 %v823_v35, %v821_v39  ;;  %v1028_v46 = vld [vmem:[#allocation2 + $0xc2] ss:$2 sm:$0xff]  ;;  %v874_v61 = vpack.c.bf16 %v864_v45, %v862_v44 }
 0x119   : > { %v564_v22 = vadd.f32 %v1642_v18, %v2021_v51  ;;  %965 = vrot.lane.b32.xlu1 %v956_v16, %s1833_s17  ;;  %v555_v23 = vpop.f32.mrb[21].mxu0  ;;  %881 = vrot.lane.b32.xlu0 %v873_v17, %s1837_s26  ;;  %v720_v50 = vld [vmem:[#allocation2 + $0xc0] ss:$2 sm:$0xff]  ;;  %v1038_v62 = vpack.c.bf16 %v1028_v46, %v1026_v55  ;;  %v744_v17 = vld [vmem:[#allocation2 + $0xc1] ss:$2 sm:$0xff] }
 0x11a   : > { %v556_v24 = vadd.f32 %v2021_v51, %v555_v23  ;;  %v1643_v25 = vpop.f32.mrb[22].mxu0  ;;  %v905_v1 = vld [vmem:[#allocation2 + $0xaa] ss:$2 sm:$0xff] }
 0x11b   : > { %v624_v28 = vmax.f32 %v564_v22, 0.0  ;;  %v567_v29 = vadd.f32 %v1643_v25, %v2021_v51  ;;  %v558_v30 = vpop.f32.mrb[23].mxu0  ;;  %v785_v7 = vld [vmem:[#allocation2 + $0xc2] ss:$2 sm:$0xff]  ;;  %v915_v8 = vpack.c.bf16 %v905_v1, %v903_v6 }
 0x11c   : > { %v622_v33 = vmax.f32 %v556_v24, 0.0  ;;  %v559_v34 = vadd.f32 %v2021_v51, %v558_v30 }
 0x11d   : > { %702 = vst.msk [vmem:[#allocation2 + $0x121] sm:$0xff] %vm388_vm1, %v624_v28  ;;  %v625_v37 = vmax.f32 %v567_v29, 0.0  ;;  %1006 = vrot.lane.b32.xlu1 %v997_v31, %s2278_s21  ;;  %922 = vrot.lane.b32.xlu0 %v914_v32, %s1838_s28  ;;  %s2282_s21 = smov 28  }
 0x11e   : > { %700 = vst.msk [vmem:[#allocation2 + $0x109] sm:$0xff] %vm388_vm1, %v622_v33  ;;  %v623_v38 = vmax.f32 %v559_v34, 0.0  ;;  %v722_v52 = vld [vmem:[#allocation2 + $0xf0] ss:$2 sm:$0xff]  ;;  %v746_v11 = vld [vmem:[#allocation2 + $0xf1] ss:$2 sm:$0xff] }
 0x11f   : > { %703 = vst.msk [vmem:[#allocation2 + $0x129] sm:$0xff] %vm388_vm1, %v625_v37  ;;  %v729_v56 = vpack.c.bf16 %v722_v52, %v720_v50  ;;  %v787_v2 = vld [vmem:[#allocation2 + $0xf2] ss:$2 sm:$0xff]  ;;  %v753_v22 = vpack.c.bf16 %v746_v11, %v744_v17  ;;  %v989_v28 = vld [vmem:[#allocation2 + $0xf1] ss:$2 sm:$0xff] }
 0x120   : > { %701 = vst.msk [vmem:[#allocation2 + $0x111] sm:$0xff] %vm388_vm1, %v623_v38  ;;  %v1646_v43 = vpop.f32.mrb[24].mxu0  ;;  %v794_v9 = vpack.c.bf16 %v787_v2, %v785_v7  ;;  %v948_v18 = vld [vmem:[#allocation2 + $0xf0] ss:$2 sm:$0xff]  ;;  %v866_v45 = vld [vmem:[#allocation2 + $0xd9] ss:$2 sm:$0xff] }
 0x121   : > { %v580_v48 = vadd.f32 %v1646_v43, %v2021_v51  ;;  %v571_v49 = vpop.f32.mrb[25].mxu0  ;;  %842 = vrot.lane.b32.xlu1 %v833_v41, %s1836_s23  ;;  %761 = vrot.lane.b32.xlu0 %v752_v42, %s1832_s16  ;;  %733 = vst.msk [vmem:[#allocation3 + $0x10] sm:$0xff] %vm388_vm1, %v729_v56  ;;  %v825_v38 = vld [vmem:[#allocation2 + $0xd8] ss:$2 sm:$0xff] }
 0x122   : > { %v572_v53 = vadd.f32 %v2021_v51, %v571_v49  ;;  %v1647_v54 = vpop.f32.mrb[26].mxu0  ;;  %v907_v52 = vld [vmem:[#allocation2 + $0xda] ss:$2 sm:$0xff] }
 0x123   : > { %v628_v58 = vmax.f32 %v580_v48, 0.0  ;;  %v583_v59 = vadd.f32 %v1647_v54, %v2021_v51  ;;  %v574_v60 = vpop.f32.mrb[27].mxu0 }
 0x124   : > { %v626_v63 = vmax.f32 %v572_v53, 0.0  ;;  %v575_v0 = vadd.f32 %v2021_v51, %v574_v60 }
 0x125   : > { %706 = vst.msk [vmem:[#allocation2 + $0x151] sm:$0xff] %vm388_vm1, %v628_v58  ;;  %v629_v4 = vmax.f32 %v583_v59, 0.0  ;;  %883 = vrot.lane.b32.xlu1 %v874_v61, %s1837_s26  ;;  %1047 = vrot.lane.b32.xlu0 %v1038_v62, %s1835_s22  ;;  %v1030_v58 = vld [vmem:[#allocation2 + $0xf2] ss:$2 sm:$0xff] }
 0x126   : > { %704 = vst.msk [vmem:[#allocation2 + $0x139] sm:$0xff] %vm388_vm1, %v626_v63  ;;  %v627_v5 = vmax.f32 %v575_v0, 0.0  ;;  %v950_v12 = vld [vmem:[#allocation2 + $0x120] ss:$2 sm:$0xff]  ;;  %v991_v26 = vld [vmem:[#allocation2 + $0x121] ss:$2 sm:$0xff] }
 0x127   : > { %707 = vst.msk [vmem:[#allocation2 + $0x159] sm:$0xff] %vm388_vm1, %v629_v4  ;;  %v957_v23 = vpack.c.bf16 %v950_v12, %v948_v18  ;;  %v748_v30 = vld [vmem:[#allocation2 + $0x121] ss:$2 sm:$0xff]  ;;  %v998_v33 = vpack.c.bf16 %v991_v26, %v989_v28  ;;  %v827_v34 = vld [vmem:[#allocation2 + $0x108] ss:$2 sm:$0xff] }
 0x128   : > { %705 = vst.msk [vmem:[#allocation2 + $0x141] sm:$0xff] %vm388_vm1, %v627_v5  ;;  %v1650_v10 = vpop.f32.mrb[28].mxu0  ;;  %v724_v35 = vld [vmem:[#allocation2 + $0x120] ss:$2 sm:$0xff]  ;;  %v834_v41 = vpack.c.bf16 %v827_v34, %v825_v38  ;;  %v868_v42 = vld [vmem:[#allocation2 + $0x109] ss:$2 sm:$0xff] }
 0x129   : > { %v596_v13 = vadd.f32 %v1650_v10, %v2021_v51  ;;  %v587_v14 = vpop.f32.mrb[29].mxu0  ;;  %924 = vrot.lane.b32.xlu1 %v915_v8, %s1838_s28  ;;  %804 = vrot.lane.b32.xlu0 %v794_v9, %s1831_s14  ;;  %v789_v37 = vld [vmem:[#allocation2 + $0x122] ss:$2 sm:$0xff]  ;;  %v875_v47 = vpack.c.bf16 %v868_v42, %v866_v45 }
 0x12a   : > { %v588_v15 = vadd.f32 %v2021_v51, %v587_v14  ;;  %v1651_v16 = vpop.f32.mrb[30].mxu0  ;;  %v909_v49 = vld [vmem:[#allocation2 + $0x10a] ss:$2 sm:$0xff] }
 0x12b   : > { %v632_v19 = vmax.f32 %v596_v13, 0.0  ;;  %v599_v20 = vadd.f32 %v1651_v16, %v2021_v51  ;;  %v590_v21 = vpop.f32.mrb[31].mxu0  ;;  %v916_v54 = vpack.c.bf16 %v909_v49, %v907_v52  ;;  %v1032_v56 = vld [vmem:[#allocation2 + $0x122] ss:$2 sm:$0xff] }
 0x12c   : > { %v630_v24 = vmax.f32 %v588_v15, 0.0  ;;  %v591_v25 = vadd.f32 %v2021_v51, %v590_v21  ;;  %v1039_v60 = vpack.c.bf16 %v1032_v56, %v1030_v58 }
 0x12d   : > { %710 = vst.msk [vmem:[#allocation2 + $0x181] sm:$0xff] %vm388_vm1, %v632_v19  ;;  %v633_v27 = vmax.f32 %v599_v20, 0.0  ;;  %763 = vrot.lane.b32.xlu1 %v753_v22, %s1832_s16  ;;  %967 = vrot.lane.b32.xlu0 %v957_v23, %s1833_s17 }
 0x12e   : > { %708 = vst.msk [vmem:[#allocation2 + $0x169] sm:$0xff] %vm388_vm1, %v630_v24  ;;  %v631_v29 = vmax.f32 %v591_v25, 0.0  ;;  %v750_v31 = vld [vmem:[#allocation2 + $0x151] ss:$2 sm:$0xff]  ;;  %v791_v51 = vld [vmem:[#allocation2 + $0x152] ss:$2 sm:$0xff] }
 0x12f   : > { %711 = vst.msk [vmem:[#allocation2 + $0x189] sm:$0xff] %vm388_vm1, %v633_v27  ;;  %v754_v32 = vpack.c.bf16 %v750_v31, %v748_v30  ;;  %v726_v36 = vld [vmem:[#allocation2 + $0x150] ss:$2 sm:$0xff]  ;;  %v795_v40 = vpack.c.bf16 %v791_v51, %v789_v37  ;;  %v993_v50 = vld [vmem:[#allocation2 + $0x151] ss:$2 sm:$0xff] }
 0x130   : > { %709 = vst.msk [vmem:[#allocation2 + $0x171] sm:$0xff] %vm388_vm1, %v631_v29  ;;  %v730_v39 = vpack.c.bf16 %v726_v36, %v724_v35  ;;  %v952_v43 = vld [vmem:[#allocation2 + $0x150] ss:$2 sm:$0xff]  ;;  %v870_v62 = vld [vmem:[#allocation2 + $0x139] ss:$2 sm:$0xff] }
 0x131   : > { %765 = vrot.lane.b32.xlu1 %v754_v32, %s1832_s16  ;;  %1008 = vrot.lane.b32.xlu0 %v998_v33, %s2282_s21  ;;  %v829_v57 = vld [vmem:[#allocation2 + $0x138] ss:$2 sm:$0xff]  ;;  %s323_s16 = sand.u32 1, %s1820_s10  }
 0x132   : > { %734 = vst.msk [vmem:[#allocation3 + $0x18] sm:$0xff] %vm388_vm1, %v730_v39  ;;  %v911_v1 = vld [vmem:[#allocation2 + $0x13a] ss:$2 sm:$0xff] }
 0x133   : > { %v1034_v4 = vld [vmem:[#allocation2 + $0x152] ss:$2 sm:$0xff] }
 0x135   : > { %806 = vrot.lane.b32.xlu1 %v795_v40, %s1831_s14  ;;  %844 = vrot.lane.b32.xlu0 %v834_v41, %s1836_s23  ;;  %v1186_v41 = vld [vmem:[%s2273_s5] sm:$0x3] }
 0x136   : > { %v954_v44 = vld [vmem:[#allocation2 + $0x180] ss:$2 sm:$0xff]  ;;  %v995_v48 = vld [vmem:[#allocation2 + $0x181] ss:$2 sm:$0xff]  ;;  %1712 = vmatprep.subr.msk.bf16.mxu1 %vm437_vm0, %v1186_v41  ;;  %v1207_v42 = vsel %vm437_vm0, %v1186_v41, 0 }
 0x137   : > { %v958_v46 = vpack.c.bf16 %v954_v44, %v952_v43  ;;  %v999_v53 = vpack.c.bf16 %v995_v48, %v993_v50  ;;  %v831_v55 = vld [vmem:[#allocation2 + $0x168] ss:$2 sm:$0xff]  ;;  %v872_v61 = vld [vmem:[#allocation2 + $0x169] ss:$2 sm:$0xff]  ;;  %v1293_v43 = vld [vmem:[%s2275_s7] sm:$0x3] }
 0x138   : > { %v835_v59 = vpack.c.bf16 %v831_v55, %v829_v57  ;;  %v876_v63 = vpack.c.bf16 %v872_v61, %v870_v62  ;;  %v913_v0 = vld [vmem:[#allocation2 + $0x16a] ss:$2 sm:$0xff]  ;;  %v1552_v44 = vld [vmem:[%s2272_s4] ss:$0 sm:$0xff] }
 0x139   : > { %969 = vrot.lane.b32.xlu1 %v958_v46, %s1833_s17  ;;  %885 = vrot.lane.b32.xlu0 %v875_v47, %s1837_s26  ;;  %v917_v2 = vpack.c.bf16 %v913_v0, %v911_v1  ;;  %v1036_v3 = vld [vmem:[#allocation2 + $0x182] ss:$2 sm:$0xff]  ;;  %s1532_s17 = sshll.u32 %s323_s16, 6 }
 0x13a   : > { %v1040_v5 = vpack.c.bf16 %v1036_v3, %v1034_v4 }
 0x13d   : > { %1010 = vrot.lane.b32.xlu1 %v999_v53, %s2282_s21  ;;  %926 = vrot.lane.b32.xlu0 %v916_v54, %s1838_s28  ;;  %s1770_s21 = sshll.u32 %s1839_s25, 4  ;;  %s1771_s21 = int_to_ptr.vmem [resolvable:$false] %s1770_s21 }
 0x141   : > { %846 = vrot.lane.b32.xlu1 %v835_v59, %s1836_s23  ;;  %1049 = vrot.lane.b32.xlu0 %v1039_v60, %s1835_s22  ;;  %v1314_v60 = vsel %vm437_vm0, %v1293_v43, 0 }
 0x145   : > { %887 = vrot.lane.b32.xlu1 %v876_v63, %s1837_s26 }
 0x149   : > { %928 = vrot.lane.b32.xlu1 %v917_v2, %s1838_s28 }
 0x14d   : > { %1051 = vrot.lane.b32.xlu1 %v1040_v5, %s1835_s22  ;;  %s1583_s22 = sshll.u32 %s1912_s13, 10  ;;  %s2226_s13 = scalar_lea.sflag [#allocation5], %s323_s16 }
 0x14e   : > { %s2217_s29 = scalar_lea.hbm %s2277_s9, %s1583_s22 }
 0x173   : > { %v801_v6 = vpop.permute.xlu1 %800  ;;  %v760_v7 = vpop.permute.xlu0 %759 }
 0x174   : > { %772 = vst.msk [vmem:[#allocation3] sm:$0xff] %vm771_vm4, %v760_v7  ;;  %v1274_v7 = vld [vmem:[%s1949_s27] ss:$2 sm:$0xff] }
 0x175   : > { %813 = vst.msk [vmem:[#allocation3] sm:$0xff] %vm812_vm5, %v801_v6 }
 0x17b   : > { %v964_v8 = vpop.permute.xlu0 %963 }
 0x17f   : > { %v1005_v9 = vpop.permute.xlu0 %1004 }
 0x183   : > { %v1046_v10 = vpop.permute.xlu0 %1045  ;;  %v803_v11 = vpop.permute.xlu1 %802 }
 0x187   : > { %v841_v12 = vpop.permute.xlu0 %840 }
 0x188   : > { %853 = vst.msk [vmem:[#allocation3] sm:$0xff] %vm852_vm6, %v841_v12 }
 0x18b   : > { %v966_v13 = vpop.permute.xlu1 %965  ;;  %v882_v14 = vpop.permute.xlu0 %881 }
 0x18c   : > { %894 = vst.msk [vmem:[#allocation3] sm:$0xff] %vm893_vm7, %v882_v14  ;;  %v1566_v14 = vld [vmem:[%s1949_s27 + $0x40] ss:$2 sm:$0xff] }
 0x18f   : > { %v1007_v15 = vpop.permute.xlu1 %1006  ;;  %v923_v16 = vpop.permute.xlu0 %922 }
 0x190   : > { %935 = vst.msk [vmem:[#allocation3] sm:$0xff] %vm934_vm8, %v923_v16  ;;  %v1568_v16 = vld [vmem:[%s1949_s27 + $0x80] ss:$2 sm:$0xff] }
 0x191   : > { %976 = vst.msk [vmem:[#allocation3] sm:$0xff] %vm975_vm9, %v964_v8  ;;  %v1565_v8 = vld [vmem:[%s1949_s27 + $0x20] ss:$2 sm:$0xff] }
 0x192   : > { %1017 = vst.msk [vmem:[#allocation3] sm:$0xff] %vm1016_vm10, %v1005_v9 }
 0x193   : > { %1058 = vst.msk [vmem:[#allocation3] sm:$0xff] %vm1057_vm11, %v1046_v10  ;;  %v843_v17 = vpop.permute.xlu1 %842  ;;  %v762_v18 = vpop.permute.xlu0 %761 }
 0x194   : > { %773 = vst.msk [vmem:[#allocation3 + $0x8] sm:$0xff] %vm771_vm4, %v762_v18 }
 0x195   : > { %814 = vst.msk [vmem:[#allocation3 + $0x8] sm:$0xff] %vm812_vm5, %v803_v11 }
 0x196   : > { %854 = vst.msk [vmem:[#allocation3 + $0x8] sm:$0xff] %vm852_vm6, %v843_v17  ;;  %v1569_v17 = vld [vmem:[%s1949_s27 + $0xa0] ss:$2 sm:$0xff] }
 0x197   : > { %v884_v19 = vpop.permute.xlu1 %883  ;;  %v1048_v20 = vpop.permute.xlu0 %1047 }
 0x198   : > { %895 = vst.msk [vmem:[#allocation3 + $0x8] sm:$0xff] %vm893_vm7, %v884_v19  ;;  %v1291_v19 = vpack.c.bf16 %v1569_v17, %v1568_v16 }
 0x19a   : > { %v1062_v21 = vld [vmem:[#allocation3] sm:$0xff] }
 0x19b   : > { %v925_v22 = vpop.permute.xlu1 %924  ;;  %1658 = vmatprep.mubr.msk.bf16.mxu1 %vm1093_vm12, %v1062_v21  ;;  %v805_v23 = vpop.permute.xlu0 %804  ;;  %v1571_v21 = vld [vmem:[%s1949_s27 + $0xe0] ss:$2 sm:$0xff] }
 0x19c   : > { %936 = vst.msk [vmem:[#allocation3 + $0x8] sm:$0xff] %vm934_vm8, %v925_v22 }
 0x19d   : > { %977 = vst.msk [vmem:[#allocation3 + $0x8] sm:$0xff] %vm975_vm9, %v966_v13  ;;  %v1289_v13 = vpack.c.bf16 %v1565_v8, %v1274_v7 }
 0x19e   : > { %1018 = vst.msk [vmem:[#allocation3 + $0x8] sm:$0xff] %vm1016_vm10, %v1007_v15  ;;  %v1567_v15 = vld [vmem:[%s1949_s27 + $0x60] ss:$2 sm:$0xff] }
 0x19f   : > { %1059 = vst.msk [vmem:[#allocation3 + $0x8] sm:$0xff] %vm1057_vm11, %v1048_v20  ;;  %v764_v24 = vpop.permute.xlu1 %763  ;;  %v968_v25 = vpop.permute.xlu0 %967  ;;  %v1290_v18 = vpack.c.bf16 %v1567_v15, %v1566_v14  ;;  %v1570_v20 = vld [vmem:[%s1949_s27 + $0xc0] ss:$2 sm:$0xff]  ;;  %s325_s27 = scalar_lea.vmem [#allocation4], %s1532_s17  ;;  %s1772_s17 = scalar_lea.vmem %s1771_s21, 2048 }
 0x1a0   : > { %774 = vst.msk [vmem:[#allocation3 + $0x10] sm:$0xff] %vm771_vm4, %v764_v24  ;;  %v1292_v22 = vpack.c.bf16 %v1571_v21, %v1570_v20  ;;  %v1572_v24 = vld [vmem:[%s2276_s8] ss:$0 sm:$0xff]  ;;  %s1420_s23 = sshll.u32 %s325_s27, 4  ;;  %s2220_s23 = int_to_ptr.vmem [resolvable:$true] %s1420_s23 }
 0x1a1   : > { %815 = vst.msk [vmem:[#allocation3 + $0x10] sm:$0xff] %vm812_vm5, %v805_v23  ;;  %v1560_v23 = vld [vmem:[%s2274_s6] ss:$0 sm:$0xff]  ;;  %s1766_s24 = scalar_lea.vmem %s2220_s23, 1024  ;;  %p1773_p0 = scmp.lt.s32.totalorder %s2220_s23, %s1771_s21 }
 0x1a2   : > { %p1767_p11 = scmp.ne.s32.totalorder %s2220_s23, %s1766_s24  ;;  %p1774_p1 = scmp.lt.s32.totalorder %s1772_s17, %s1766_s24 }
 0x1a3   : > { %v766_v26 = vpop.permute.xlu1 %765  ;;  %v1009_v27 = vpop.permute.xlu0 %1008 }
 0x1a4   : > { %775 = vst.msk [vmem:[#allocation3 + $0x18] sm:$0xff] %vm771_vm4, %v766_v26  ;;  %p1768_p12 = pnand %p1767_p11, %p1929_p5  ;;  %p1775_p2 = por %p1774_p1, %p1773_p0 }
 0x1a6   : > { %v1063_v28 = vld [vmem:[#allocation3 + $0x8] sm:$0xff]  ;;  %p1769_p13 = pneg %p1768_p12 }
 0x1a7   : > { %v807_v29 = vpop.permute.xlu1 %806  ;;  %1659 = vmatmul.mubr.msk.bf16.vlgmr.msra.gmra.mrb[0].mxu1 %vm1093_vm12, %v1063_v28  ;;  %v845_v30 = vpop.permute.xlu0 %844 }
 0x1a8   : > { %816 = vst.msk [vmem:[#allocation3 + $0x18] sm:$0xff] %vm812_vm5, %v807_v29  ;;  %1667 = vmatpush3.bf16.msra.mxu1 %v1207_v42  ;;  %p1776_p3 = pnand %p1775_p2, %p1769_p13 }
 0x1a9   : > { %855 = vst.msk [vmem:[#allocation3 + $0x10] sm:$0xff] %vm852_vm6, %v845_v30  ;;  %1713 = vmatprep.subr.msk.bf16.mxu1 %vm437_vm0, %v1293_v43 }
 0x1ab   : > { %v970_v31 = vpop.permute.xlu1 %969  ;;  %v886_v32 = vpop.permute.xlu0 %885 }
 0x1ac   : > { %896 = vst.msk [vmem:[#allocation3 + $0x10] sm:$0xff] %vm893_vm7, %v886_v32 }
 0x1af   : > { %v1011_v33 = vpop.permute.xlu1 %1010  ;;  %v927_v51 = vpop.permute.xlu0 %926 }
 0x1b0   : > { %937 = vst.msk [vmem:[#allocation3 + $0x10] sm:$0xff] %vm934_vm8, %v927_v51 }
 0x1b1   : > { %978 = vst.msk [vmem:[#allocation3 + $0x10] sm:$0xff] %vm975_vm9, %v968_v25  ;;  %v1692_v25 = vadd.f32 %v1572_v24, %v1560_v23 }
 0x1b2   : > { %1019 = vst.msk [vmem:[#allocation3 + $0x10] sm:$0xff] %vm1016_vm10, %v1009_v27 }
 0x1b3   : > { %v847_v34 = vpop.permute.xlu1 %846  ;;  %v1050_v35 = vpop.permute.xlu0 %1049 }
 0x1b4   : > { %856 = vst.msk [vmem:[#allocation3 + $0x18] sm:$0xff] %vm852_vm6, %v847_v34 }
 0x1b5   : > { %1060 = vst.msk [vmem:[#allocation3 + $0x10] sm:$0xff] %vm1057_vm11, %v1050_v35 }
 0x1b7   : > { %v888_v36 = vpop.permute.xlu1 %887 }
 0x1b8   : > { %897 = vst.msk [vmem:[#allocation3 + $0x18] sm:$0xff] %vm893_vm7, %v888_v36 }
 0x1bb   : > { %v929_v37 = vpop.permute.xlu1 %928 }
 0x1bc   : > { %v1064_v38 = vld [vmem:[#allocation3 + $0x10] sm:$0xff]  ;;  %938 = vst.msk [vmem:[#allocation3 + $0x18] sm:$0xff] %vm934_vm8, %v929_v37 }
 0x1bd   : > { %1662 = vmatprep.mubr.msk.bf16.mxu1 %vm1093_vm12, %v1064_v38  ;;  %979 = vst.msk [vmem:[#allocation3 + $0x18] sm:$0xff] %vm975_vm9, %v970_v31 }
 0x1be   : > { %1020 = vst.msk [vmem:[#allocation3 + $0x18] sm:$0xff] %vm1016_vm10, %v1011_v33 }
 0x1bf   : > { %v1052_v39 = vpop.permute.xlu1 %1051 }
 0x1c0   : > { %1061 = vst.msk [vmem:[#allocation3 + $0x18] sm:$0xff] %vm1057_vm11, %v1052_v39 }
 0x1c7   : > { %v1065_v40 = vld [vmem:[#allocation3 + $0x18] sm:$0xff] }
 0x1c8   : > { %1663 = vmatmul.mubr.msk.bf16.gmra.mrb[4].mxu1 %vm1093_vm12, %v1065_v40 }
 0x27a   : > { %v1660_v45 = vpop.f32.mrb[0].mxu1 }
 0x27b   : > { %v1152_v46 = vadd.f32 %v1660_v45, %v1552_v44  ;;  %v1143_v47 = vpop.f32.mrb[1].mxu1 }
 0x27c   : > { %v1144_v48 = vadd.f32 %v1552_v44, %v1143_v47  ;;  %v1661_v49 = vpop.f32.mrb[2].mxu1 }
 0x27d   : > { %v1155_v50 = vadd.f32 %v1661_v49, %v1552_v44  ;;  %v1146_v52 = vpop.f32.mrb[3].mxu1  ;;  %v1176_v54 = vmax.f32 %v1152_v46, 0.0 }
 0x27e   : > { %v1147_v53 = vadd.f32 %v1552_v44, %v1146_v52  ;;  %v1174_v56 = vmax.f32 %v1144_v48, 0.0 }
 0x27f   : > { %v1177_v55 = vmax.f32 %v1155_v50, 0.0 }
 0x280   : > { %v1175_v57 = vmax.f32 %v1147_v53, 0.0 }
 0x281   : > { %v1183_v58 = vpack.c.bf16 %v1177_v55, %v1176_v54 }
 0x282   : > { %v1182_v59 = vpack.c.bf16 %v1175_v57, %v1174_v56 }
 0x284   : > { %1668 = vmatprep.mubr.msk.bf16.mxu1 %vm388_vm1, %v1182_v59 }
 0x285   : > { %1669 = vmatmul.mubr.msk.bf16.vlgmr.msra.gmra.mrb[8].mxu1 %vm388_vm1, %v1183_v58 }
 0x286   : > { %1677 = vmatpush3.bf16.msra.mxu1 %v1314_v60 }
 0x29b   : > { %v1664_v61 = vpop.f32.mrb[4].mxu1 }
 0x29c   : > { %v1168_v62 = vadd.f32 %v1664_v61, %v1552_v44  ;;  %v1159_v63 = vpop.f32.mrb[5].mxu1 }
 0x29d   : > { %v1160_v0 = vadd.f32 %v1552_v44, %v1159_v63  ;;  %v1665_v1 = vpop.f32.mrb[6].mxu1 }
 0x29e   : > { %v1171_v2 = vadd.f32 %v1665_v1, %v1552_v44  ;;  %v1162_v3 = vpop.f32.mrb[7].mxu1  ;;  %v1180_v5 = vmax.f32 %v1168_v62, 0.0 }
 0x29f   : > { %v1163_v4 = vadd.f32 %v1552_v44, %v1162_v3  ;;  %v1178_v9 = vmax.f32 %v1160_v0, 0.0 }
 0x2a0   : > { %v1181_v6 = vmax.f32 %v1171_v2, 0.0 }
 0x2a1   : > { %v1179_v10 = vmax.f32 %v1163_v4, 0.0 }
 0x2a2   : > { %v1185_v11 = vpack.c.bf16 %v1181_v6, %v1180_v5 }
 0x2a3   : > { %v1184_v12 = vpack.c.bf16 %v1179_v10, %v1178_v9 }
 0x2a5   : > { %1672 = vmatprep.mubr.msk.bf16.mxu1 %vm388_vm1, %v1184_v12 }
 0x2a6   : > { %1673 = vmatmul.mubr.msk.bf16.gmra.mrb[12].mxu1 %vm388_vm1, %v1185_v11 }
 0x2a7   : > { %1678 = vmatprep.mubr.msk.bf16.mxu1 %vm388_vm1, %v1289_v13 }
 0x2ae   : > { %1679 = vmatmul.mubr.msk.bf16.vlgmr.msra.gmra.mrb[8].mxu1 %vm388_vm1, %v1290_v18 }
 0x2af   : > { %1682 = vmatprep.mubr.msk.bf16.mxu1 %vm388_vm1, %v1291_v19 }
 0x2b6   : > { %1683 = vmatmul.mubr.msk.bf16.gmra.mrb[12].mxu1 %vm388_vm1, %v1292_v22 }
 0x381   : > { %v1680_v26 = vpop.f32.mrb[8].mxu1 }
 0x382   : > { %v1686_v27 = vadd.f32 %v1680_v26, %v1560_v23  ;;  %v1350_v28 = vpop.f32.mrb[9].mxu1 }
 0x383   : > { %v1688_v29 = vadd.f32 %v1560_v23, %v1350_v28  ;;  %v1681_v30 = vpop.f32.mrb[10].mxu1 }
 0x384   : > { %v1687_v31 = vadd.f32 %v1686_v27, %v1572_v24  ;;  %v1691_v32 = vadd.f32 %v1692_v25, %v1681_v30  ;;  %v1353_v33 = vpop.f32.mrb[11].mxu1 }
 0x385   : > { %v1689_v51 = vadd.f32 %v1688_v29, %v1572_v24  ;;  %v1693_v34 = vadd.f32 %v1692_v25, %v1353_v33 }
 0x386   : > { %v1391_v35 = vmax.f32 %v1687_v31, 0.0  ;;  %v1392_v36 = vmax.f32 %v1691_v32, 0.0 }
 0x387   : > { %v1389_v37 = vmax.f32 %v1689_v51, 0.0  ;;  %v1390_v38 = vmax.f32 %v1693_v34, 0.0 }
 0x388   : > { %1400 = vst.msk [vmem:[%s325_s27 + $0x10] sm:$0xff] %vm1397_vm13, %v1391_v35  ;;  %1401 = vst.msk [vmem:[%s325_s27 + $0x18] sm:$0xff] %vm1397_vm13, %v1392_v36 }
 0x389   : > { %1398 = vst.msk [vmem:[%s325_s27] sm:$0xff] %vm1397_vm13, %v1389_v37  ;;  %1399 = vst.msk [vmem:[%s325_s27 + $0x8] sm:$0xff] %vm1397_vm13, %v1390_v38  ;;  %v1684_v39 = vpop.f32.mrb[12].mxu1 }
 0x38a   : > { %v1695_v40 = vadd.f32 %v1692_v25, %v1684_v39  ;;  %v1366_v41 = vpop.f32.mrb[13].mxu1 }
 0x38b   : > { %v1697_v42 = vadd.f32 %v1692_v25, %v1366_v41  ;;  %v1685_v43 = vpop.f32.mrb[14].mxu1 }
 0x38c   : > { %v1395_v44 = vmax.f32 %v1695_v40, 0.0  ;;  %v1699_v45 = vadd.f32 %v1692_v25, %v1685_v43  ;;  %v1369_v46 = vpop.f32.mrb[15].mxu1 }
 0x38d   : > { %v1393_v47 = vmax.f32 %v1697_v42, 0.0  ;;  %v1701_v48 = vadd.f32 %v1692_v25, %v1369_v46 }
 0x38e   : > { %1404 = vst.msk [vmem:[%s325_s27 + $0x30] sm:$0xff] %vm1397_vm13, %v1395_v44  ;;  %v1396_v49 = vmax.f32 %v1699_v45, 0.0 }
 0x38f   : > { %1402 = vst.msk [vmem:[%s325_s27 + $0x20] sm:$0xff] %vm1397_vm13, %v1393_v47  ;;  %v1394_v50 = vmax.f32 %v1701_v48, 0.0 }
 0x390   : > { %1405 = vst.msk [vmem:[%s325_s27 + $0x38] sm:$0xff] %vm1397_vm13, %v1396_v49 }
 0x391   : > { %1403 = vst.msk [vmem:[%s325_s27 + $0x28] sm:$0xff] %vm1397_vm13, %v1394_v50 }
 0x392   : > { %1779 = shalt.err (!%p1776_p3)
}
 0x393   : > { %s1780_s16 = scalar_lea.hbm %s2217_s29, 1024  ;;  %s1784_s26 = scalar_lea.hbm %s2277_s9, 2048 }
 0x394   : > { %p1781_p4 = scmp.ne.s32.totalorder %s2217_s29, %s1780_s16  ;;  %p1785_p9 = scmp.lt.u32.totalorder %s2217_s29, %s2277_s9 }
 0x395   : > { %p1786_p10 = scmp.lt.u32.totalorder %s1784_s26, %s1780_s16  ;;  %p1788_p12 = scmp.lt.u32.totalorder %s1780_s16, %s2217_s29 }
 0x396   : > { %p1782_p7 = pnand %p1781_p4, %p1929_p5 }
 0x397   : > { %p1787_p11 = por %p1786_p10, %p1785_p9 }
 0x398   : > { %p1783_p8 = pneg %p1782_p7 }
 0x399   : > { %p1789_p13 = por %p1788_p12, %p1787_p11 }
 0x39b   : > { %p1790_p0 = pnand %p1789_p13, %p1783_p8 }
 0x39d   : > { %1793 = shalt.err (!%p1790_p0)
}
 0x39e   : > { %s1840_s24 = smov 128  }
 0x39f   : > { %1714 = dma.vmem_to_hbm [thread:$0]  (%p1929_p5), %s2220_s23, 1024, %s2217_s29, %s2226_s13, %s1840_s24, %s1840_s24, %s1831_s14  }
 0x3a0 PF: > { %p1720_p1 = scmp.ge.s32.totalorder %s1828_s12, 2  ;;  %s1435_s21 = sand.u32 1, %s1816_s30  }
 0x3a1   : > { %s1436_s17 = scalar_lea.sflag [#allocation5], %s1435_s21 }
 0x3a2   : > { %p1717_p2 = pnand %p1720_p1, %p1933_p6 }
 0x3a4   : > { %1811 = dma.done.wait (!%p1717_p2), %s1436_s17, 1024  }
 0x3a5   : > { %1813 = vsyncadd (!%p1717_p2), %s1436_s17, 4294966272  ;;  %p19_p3 = scmp.ge.s32.totalorder %s1916_s15, 4   ;;  %s2283_s30 = smov %s1820_s10 }
 0x3a6   : > { %s2284_s10 = smov %s1824_s11  ;;  %s2285_s11 = smov %s1927_s18 }
 0x3a7   : > { %s2286_s12 = smov %s1916_s15  ;;  %21 = sbr.rel (!%p19_p3) target bundleno = 3 (0x3), region = 170 }
 0x3ae   :  { %1441 = vsyncpa [#allocation5], 1 }
 0x3af   :  { %1443 = vsyncpa [#allocation5 + $0x1], 1 }

// kernel: tpu_custom_call.1
= control target key start
LH: loop header
LB: loop body
LE: loop exit
PB: predicated region body
PF: predicated region fallthrough
CT: control target
= control target key end

     0   :  { %14 = vsyncpa [#allocation5], 0  ;;  %s2268_s0 = inlined_call_operand.vmem [shape: f32[2,16,16,4], index: 0, kind: input, shape index: {}]   ;;  %s2269_s1 = inlined_call_operand.vmem [shape: bf16[4,4], index: 1, kind: input, shape index: {}]   ;;  %s2270_s2 = inlined_call_operand.vmem [shape: f32[1,4], index: 2, kind: input, shape index: {}]   ;;  %s2271_s3 = inlined_call_operand.vmem [shape: bf16[36,4], index: 3, kind: input, shape index: {}]   ;;  %s2272_s4 = inlined_call_operand.vmem [shape: f32[1,4], index: 4, kind: input, shape index: {}]   ;;  %s2273_s5 = inlined_call_operand.vmem [shape: bf16[4,16], index: 5, kind: input, shape index: {}]   ;;  %s2274_s6 = inlined_call_operand.vmem [shape: f32[1,16], index: 6, kind: input, shape index: {}]   ;;  %s2275_s7 = inlined_call_operand.vmem [shape: bf16[4,16], index: 7, kind: input, shape index: {}]   ;;  %s2276_s8 = inlined_call_operand.vmem [shape: f32[1,16], index: 8, kind: input, shape index: {}]   ;;  %s2277_s9 = inlined_call_operand.hbm [shape: f32[2,8,8,16], index: 9, kind: output, shape index: {}]  }
   0x1   :  { %16 = vsyncpa [#allocation5 + $0x1], 0  ;;  %s1891_s30 = smov 0   ;;  %s1893_s10 = smov 0  }
   0x2   :  { %s1895_s11 = smov 0   ;;  %s1897_s12 = smov 0  }
   0x3 LB: > { %s1912_s13 = sadd.s32 4294967295, %s1828_s12   ;;  %s1528_s14 = sadd.s32 4294967294, %s1828_s12   ;;  %s1828_s12 = sphi %s1897_s12, %s2286_s12   ;;  %s1824_s11 = sphi %s1895_s11, %s2285_s11   ;;  %s1820_s10 = sphi %s1893_s10, %s2284_s10   ;;  %s1816_s30 = sphi %s1891_s30, %s2283_s30  }
   0x4   : > { %s1916_s15 = sadd.s32 1, %s1828_s12   ;;  %s223_s16 = sadd.s32 1, %s1824_s11 }
   0x5   : > { %s220_s17 = ssub.s32 %s1828_s12, %s1916_s15  ;;  %p233_p0 = scmp.ne.s32.totalorder %s1824_s11, %s1820_s10 }
   0x6   : > { %p221_p1 = scmp.eq.s32.totalorder %s220_s17, 0  ;;  %p234_p2 = scmp.eq.s32.totalorder %s1912_s13, 1 }
   0x7   : > { %p239_p3 = scmp.ne.s32.totalorder %s1820_s10, %s1816_s30  ;;  %p240_p4 = scmp.eq.s32.totalorder %s1528_s14, 1 }
   0x8   : > { %s1927_s18 = scalar_select %p221_p1, %s1824_s11, %s223_s16  }
   0x9   : > { %p1929_p5 = por %p234_p2, %p233_p0  ;;  %p1933_p6 = por %p240_p4, %p239_p3 }
   0xa   : > { %p1531_p7 = scmp.ge.s32.totalorder %s1828_s12, 1  ;;  %p290_p8 = scmp.lt.s32.totalorder %s1828_s12, 3 }
   0xc   : > { %p291_p9 = pnand %p1531_p7, %p290_p8 }
   0xd   : > { %v380_v0 = vld [vmem:[%s2269_s1] sm:$0x3] (!%p291_p9)  ;;  %vm437_vm0 = vcmask (!%p291_p9), 1041408   ;;  %p326_p10 = scmp.lt.s32.totalorder (!%p291_p9), %s1912_s13, 1  ;;  %vm388_vm1 = vcmask (!%p291_p9), 31744   ;;  %v1830_v50 = vmov (!%p291_p9), 0.0  }
   0xe   : > { %294 = sbr.rel (%p291_p9) target bundleno = 928 (0x3a0), region = 56  ;;  %1710 = vmatprep.subr.msk.bf16.mxu0 (!%p291_p9), %vm437_vm0, %v380_v0  ;;  %v439_v1 = vsel (!%p291_p9), %vm437_vm0, %v380_v0, 0  ;;  %634 = vst.msk [vmem:[#allocation2] sm:$0xff] (!%p291_p9), %vm388_vm1, %v1830_v50  ;;  %635 = vst.msk [vmem:[#allocation2 + $0x8] sm:$0xff] (!%p291_p9), %vm388_vm1, %v1830_v50  ;;  %vm636_vm2 = vcmask (!%p291_p9), 25600   ;;  %vm642_vm3 = vcmask (!%p291_p9), 24576  }
   0xf   : > { %1619 = vmatpush3.bf16.msra.mxu0 (!%p291_p9), %v439_v1  ;;  %637 = vst.msk [vmem:[#allocation2 + $0x10] sm:$0x3] (!%p291_p9), %vm636_vm2, %v1830_v50  ;;  %v2021_v51 = vld [vmem:[%s2270_s2] ss:$0 sm:$0xff] (!%p291_p9)  ;;  %s1831_s14 = smov (!%p291_p9), 8   ;;  %s1832_s16 = smov (!%p291_p9), 4  }
  0x10   : > { %643 = vst.msk [vmem:[#allocation2] sm:$0x1] (!%p291_p9), %vm642_vm3, %v1830_v50  ;;  %644 = vst.msk [vmem:[#allocation2 + $0x18] sm:$0x1] (!%p291_p9), %vm642_vm3, %v1830_v50  ;;  %s1833_s17 = smov (!%p291_p9), 24   ;;  %s2278_s21 = smov (!%p291_p9), 28  }
  0x11   : > { %645 = vst.msk [vmem:[#allocation2 + $0x30] sm:$0x1] (!%p291_p9), %vm642_vm3, %v1830_v50  ;;  %646 = vst.msk [vmem:[#allocation2 + $0x48] sm:$0x1] (!%p291_p9), %vm642_vm3, %v1830_v50  ;;  %s1835_s22 = smov (!%p291_p9), 32   ;;  %s1837_s26 = smov (!%p291_p9), 16  }
  0x12   : > { %647 = vst.msk [vmem:[#allocation2 + $0x60] sm:$0x1] (!%p291_p9), %vm642_vm3, %v1830_v50  ;;  %648 = vst.msk [vmem:[#allocation2 + $0x78] sm:$0x1] (!%p291_p9), %vm642_vm3, %v1830_v50  ;;  %s1838_s28 = smov (!%p291_p9), 20   ;;  %vm771_vm4 = vcmask (!%p291_p9), 64544  }
  0x13   : > { %649 = vst.msk [vmem:[#allocation2 + $0x90] sm:$0x1] (!%p291_p9), %vm642_vm3, %v1830_v50  ;;  %650 = vst.msk [vmem:[#allocation2 + $0xa8] sm:$0x1] (!%p291_p9), %vm642_vm3, %v1830_v50  ;;  %vm812_vm5 = vcmask (!%p291_p9), 97344   ;;  %vm852_vm6 = vcmask (!%p291_p9), 130144  }
  0x14   : > { %651 = vst.msk [vmem:[#allocation2 + $0xc0] sm:$0x1] (!%p291_p9), %vm642_vm3, %v1830_v50  ;;  %652 = vst.msk [vmem:[#allocation2 + $0xd8] sm:$0x1] (!%p291_p9), %vm642_vm3, %v1830_v50  ;;  %vm893_vm7 = vcmask (!%p291_p9), 162944   ;;  %vm934_vm8 = vcmask (!%p291_p9), 195744  }
  0x15   : > { %s327_s23 = scalar_select %p326_p10, %s1912_s13, 1  ;;  %653 = vst.msk [vmem:[#allocation2 + $0xf0] sm:$0x1] %vm642_vm3, %v1830_v50  ;;  %654 = vst.msk [vmem:[#allocation2 + $0x108] sm:$0x1] %vm642_vm3, %v1830_v50  ;;  %vm975_vm9 = vcmask 228544  }
  0x16   : > { %655 = vst.msk [vmem:[#allocation2 + $0x120] sm:$0x1] %vm642_vm3, %v1830_v50  ;;  %656 = vst.msk [vmem:[#allocation2 + $0x138] sm:$0x1] %vm642_vm3, %v1830_v50  ;;  %vm1016_vm10 = vcmask 261344   ;;  %vm1057_vm11 = vcmask 294144  }
  0x17   : > { %s1582_s24 = sshll.u32 %s327_s23, 8  ;;  %657 = vst.msk [vmem:[#allocation2 + $0x150] sm:$0x1] %vm642_vm3, %v1830_v50  ;;  %658 = vst.msk [vmem:[#allocation2 + $0x168] sm:$0x1] %vm642_vm3, %v1830_v50  ;;  %s1836_s23 = smov 12  }
  0x18   : > { %s1949_s27 = scalar_lea.vmem %s2268_s0, %s1582_s24  ;;  %659 = vst.msk [vmem:[#allocation2 + $0x180] sm:$0x1] %vm642_vm3, %v1830_v50  ;;  %vm1093_vm12 = vcmask 293888   ;;  %vm1397_vm13 = vcmask 130048   ;;  %s1839_s25 = smov [#allocation4]  }
  0x19   : > { %v332_v2 = vld [vmem:[%s1949_s27] sm:$0xff]  ;;  %v333_v3 = vld [vmem:[%s1949_s27 + $0x8] sm:$0xff]  ;;  %v334_v4 = vld [vmem:[%s1949_s27 + $0x10] sm:$0xff] }
  0x1a   : > { %v364_v5 = vpack.c.bf16 %v333_v3, %v332_v2  ;;  %v335_v6 = vld [vmem:[%s1949_s27 + $0x18] sm:$0xff]  ;;  %v336_v7 = vld [vmem:[%s1949_s27 + $0x20] sm:$0xff]  ;;  %v337_v8 = vld [vmem:[%s1949_s27 + $0x28] sm:$0xff] }
  0x1b   : > { %v365_v9 = vpack.c.bf16 %v335_v6, %v334_v4  ;;  %v366_v10 = vpack.c.bf16 %v337_v8, %v336_v7  ;;  %v338_v11 = vld [vmem:[%s1949_s27 + $0x30] sm:$0xff]  ;;  %v339_v12 = vld [vmem:[%s1949_s27 + $0x38] sm:$0xff]  ;;  %v340_v13 = vld [vmem:[%s1949_s27 + $0x40] sm:$0xff] }
  0x1c   : > { %1620 = vmatprep.mubr.msk.bf16.mxu0 %vm388_vm1, %v364_v5  ;;  %v341_v14 = vld [vmem:[%s1949_s27 + $0x48] sm:$0xff]  ;;  %v367_v15 = vpack.c.bf16 %v339_v12, %v338_v11  ;;  %v342_v17 = vld [vmem:[%s1949_s27 + $0x50] sm:$0xff]  ;;  %v343_v18 = vld [vmem:[%s1949_s27 + $0x58] sm:$0xff] }
  0x1d   : > { %1621 = vmatmul.mubr.msk.bf16.vlgmr.msra.gmra.mrb[0].mxu0 %vm388_vm1, %v365_v9  ;;  %v368_v16 = vpack.c.bf16 %v341_v14, %v340_v13  ;;  %v344_v19 = vld [vmem:[%s1949_s27 + $0x60] sm:$0xff]  ;;  %v345_v20 = vld [vmem:[%s1949_s27 + $0x68] sm:$0xff]  ;;  %v369_v21 = vpack.c.bf16 %v343_v18, %v342_v17  ;;  %v346_v23 = vld [vmem:[%s1949_s27 + $0x70] sm:$0xff] }
  0x1e   : > { %1624 = vmatprep.mubr.msk.bf16.mxu0 %vm388_vm1, %v366_v10  ;;  %v370_v22 = vpack.c.bf16 %v345_v20, %v344_v19  ;;  %v347_v24 = vld [vmem:[%s1949_s27 + $0x78] sm:$0xff]  ;;  %v348_v25 = vld [vmem:[%s1949_s27 + $0x80] sm:$0xff]  ;;  %v349_v26 = vld [vmem:[%s1949_s27 + $0x88] sm:$0xff] }
  0x1f   : > { %v371_v27 = vpack.c.bf16 %v347_v24, %v346_v23  ;;  %v372_v28 = vpack.c.bf16 %v349_v26, %v348_v25  ;;  %v350_v29 = vld [vmem:[%s1949_s27 + $0x90] sm:$0xff]  ;;  %v351_v30 = vld [vmem:[%s1949_s27 + $0x98] sm:$0xff]  ;;  %v352_v31 = vld [vmem:[%s1949_s27 + $0xa0] sm:$0xff] }
  0x20   : > { %v353_v32 = vld [vmem:[%s1949_s27 + $0xa8] sm:$0xff]  ;;  %v373_v33 = vpack.c.bf16 %v351_v30, %v350_v29  ;;  %v354_v35 = vld [vmem:[%s1949_s27 + $0xb0] sm:$0xff]  ;;  %v355_v36 = vld [vmem:[%s1949_s27 + $0xb8] sm:$0xff] }
  0x21   : > { %v374_v34 = vpack.c.bf16 %v353_v32, %v352_v31  ;;  %v356_v37 = vld [vmem:[%s1949_s27 + $0xc0] sm:$0xff]  ;;  %v357_v38 = vld [vmem:[%s1949_s27 + $0xc8] sm:$0xff]  ;;  %v375_v39 = vpack.c.bf16 %v355_v36, %v354_v35  ;;  %v358_v41 = vld [vmem:[%s1949_s27 + $0xd0] sm:$0xff] }
  0x22   : > { %v376_v40 = vpack.c.bf16 %v357_v38, %v356_v37  ;;  %v359_v42 = vld [vmem:[%s1949_s27 + $0xd8] sm:$0xff]  ;;  %v360_v43 = vld [vmem:[%s1949_s27 + $0xe0] sm:$0xff]  ;;  %v361_v44 = vld [vmem:[%s1949_s27 + $0xe8] sm:$0xff] }
  0x23   : > { %v377_v45 = vpack.c.bf16 %v359_v42, %v358_v41  ;;  %v378_v46 = vpack.c.bf16 %v361_v44, %v360_v43  ;;  %v362_v47 = vld [vmem:[%s1949_s27 + $0xf0] sm:$0xff]  ;;  %v363_v48 = vld [vmem:[%s1949_s27 + $0xf8] sm:$0xff]  ;;  %v736_v11 = vld [vmem:[#allocation2 + $0x1] ss:$2 sm:$0xff] }
  0x24   : > { %v379_v49 = vpack.c.bf16 %v363_v48, %v362_v47  ;;  %v777_v10 = vld [vmem:[#allocation2 + $0x2] ss:$2 sm:$0xff] }
  0x25   : > { %1625 = vmatmul.mubr.msk.bf16.gmra.mrb[4].mxu0 %vm388_vm1, %v367_v15  ;;  %v712_v18 = vld [vmem:[#allocation2] ss:$2 sm:$0xff] }
  0x26   : > { %1628 = vmatprep.mubr.msk.bf16.mxu0 %vm388_vm1, %v368_v16 }
  0x2d   : > { %1629 = vmatmul.mubr.msk.bf16.gmra.mrb[8].mxu0 %vm388_vm1, %v369_v21 }
  0x2e   : > { %1632 = vmatprep.mubr.msk.bf16.mxu0 %vm388_vm1, %v370_v22 }
  0x35   : > { %1633 = vmatmul.mubr.msk.bf16.gmra.mrb[12].mxu0 %vm388_vm1, %v371_v27 }
  0x36   : > { %1636 = vmatprep.mubr.msk.bf16.mxu0 %vm388_vm1, %v372_v28 }
  0x3d   : > { %1637 = vmatmul.mubr.msk.bf16.gmra.mrb[16].mxu0 %vm388_vm1, %v373_v33 }
  0x3e   : > { %1640 = vmatprep.mubr.msk.bf16.mxu0 %vm388_vm1, %v374_v34 }
  0x45   : > { %1641 = vmatmul.mubr.msk.bf16.gmra.mrb[20].mxu0 %vm388_vm1, %v375_v39 }
  0x46   : > { %1644 = vmatprep.mubr.msk.bf16.mxu0 %vm388_vm1, %v376_v40 }
  0x4d   : > { %1645 = vmatmul.mubr.msk.bf16.gmra.mrb[24].mxu0 %vm388_vm1, %v377_v45 }
  0x4e   : > { %1648 = vmatprep.mubr.msk.bf16.mxu0 %vm388_vm1, %v378_v46 }
  0x55   : > { %1649 = vmatmul.mubr.msk.bf16.gmra.mrb[28].mxu0 %vm388_vm1, %v379_v49 }
  0xf0   : > { %v1622_v52 = vpop.f32.mrb[0].mxu0 }
  0xf1   : > { %v484_v53 = vadd.f32 %v1622_v52, %v2021_v51  ;;  %v475_v54 = vpop.f32.mrb[1].mxu0 }
  0xf2   : > { %v476_v55 = vadd.f32 %v2021_v51, %v475_v54  ;;  %v1623_v56 = vpop.f32.mrb[2].mxu0 }
  0xf3   : > { %v604_v57 = vmax.f32 %v484_v53, 0.0  ;;  %v487_v58 = vadd.f32 %v1623_v56, %v2021_v51  ;;  %v478_v59 = vpop.f32.mrb[3].mxu0 }
  0xf4   : > { %v602_v60 = vmax.f32 %v476_v55, 0.0  ;;  %v479_v61 = vadd.f32 %v2021_v51, %v478_v59 }
  0xf5   : > { %682 = vst.msk [vmem:[#allocation2 + $0x31] sm:$0xff] %vm388_vm1, %v604_v57  ;;  %v605_v62 = vmax.f32 %v487_v58, 0.0 }
  0xf6   : > { %680 = vst.msk [vmem:[#allocation2 + $0x19] sm:$0xff] %vm388_vm1, %v602_v60  ;;  %v603_v63 = vmax.f32 %v479_v61, 0.0 }
  0xf7   : > { %683 = vst.msk [vmem:[#allocation2 + $0x39] sm:$0xff] %vm388_vm1, %v605_v62 }
  0xf8   : > { %681 = vst.msk [vmem:[#allocation2 + $0x21] sm:$0xff] %vm388_vm1, %v603_v63  ;;  %v1626_v0 = vpop.f32.mrb[4].mxu0 }
  0xf9   : > { %v500_v1 = vadd.f32 %v1626_v0, %v2021_v51  ;;  %v491_v2 = vpop.f32.mrb[5].mxu0 }
  0xfa   : > { %v492_v3 = vadd.f32 %v2021_v51, %v491_v2  ;;  %v1627_v4 = vpop.f32.mrb[6].mxu0 }
  0xfb   : > { %v608_v5 = vmax.f32 %v500_v1, 0.0  ;;  %v503_v6 = vadd.f32 %v1627_v4, %v2021_v51  ;;  %v494_v7 = vpop.f32.mrb[7].mxu0 }
  0xfc   : > { %v606_v8 = vmax.f32 %v492_v3, 0.0  ;;  %v495_v9 = vadd.f32 %v2021_v51, %v494_v7 }
  0xfd   : > { %686 = vst.msk [vmem:[#allocation2 + $0x61] sm:$0xff] %vm388_vm1, %v608_v5  ;;  %v609_v12 = vmax.f32 %v503_v6, 0.0 }
  0xfe   : > { %684 = vst.msk [vmem:[#allocation2 + $0x49] sm:$0xff] %vm388_vm1, %v606_v8  ;;  %v607_v13 = vmax.f32 %v495_v9, 0.0  ;;  %v779_v14 = vld [vmem:[#allocation2 + $0x32] ss:$2 sm:$0xff]  ;;  %v738_v15 = vld [vmem:[#allocation2 + $0x31] ss:$2 sm:$0xff] }
  0xff   : > { %687 = vst.msk [vmem:[#allocation2 + $0x69] sm:$0xff] %vm388_vm1, %v609_v12  ;;  %v792_v16 = vpack.c.bf16 %v779_v14, %v777_v10  ;;  %v751_v17 = vpack.c.bf16 %v738_v15, %v736_v11  ;;  %v714_v22 = vld [vmem:[#allocation2 + $0x30] ss:$2 sm:$0xff]  ;;  %v981_v42 = vld [vmem:[#allocation2 + $0x31] ss:$2 sm:$0xff] }
 0x100   : > { %685 = vst.msk [vmem:[#allocation2 + $0x51] sm:$0xff] %vm388_vm1, %v607_v13  ;;  %v1630_v19 = vpop.f32.mrb[8].mxu0  ;;  %v727_v25 = vpack.c.bf16 %v714_v22, %v712_v18  ;;  %v940_v33 = vld [vmem:[#allocation2 + $0x30] ss:$2 sm:$0xff]  ;;  %v858_v12 = vld [vmem:[#allocation2 + $0x19] ss:$2 sm:$0xff] }
 0x101   : > { %v516_v20 = vadd.f32 %v1630_v19, %v2021_v51  ;;  %800 = vrot.lane.b32.xlu1 %v792_v16, %s1831_s14  ;;  %759 = vrot.lane.b32.xlu0 %v751_v17, %s1832_s16  ;;  %v507_v21 = vpop.f32.mrb[9].mxu0  ;;  %v1022_v52 = vld [vmem:[#allocation2 + $0x32] ss:$2 sm:$0xff] }
 0x102   : > { %v508_v23 = vadd.f32 %v2021_v51, %v507_v21  ;;  %v1631_v24 = vpop.f32.mrb[10].mxu0  ;;  %731 = vst.msk [vmem:[#allocation3] sm:$0xff] %vm388_vm1, %v727_v25  ;;  %v817_v62 = vld [vmem:[#allocation2 + $0x18] ss:$2 sm:$0xff] }
 0x103   : > { %v612_v26 = vmax.f32 %v516_v20, 0.0  ;;  %v519_v27 = vadd.f32 %v1631_v24, %v2021_v51  ;;  %v510_v28 = vpop.f32.mrb[11].mxu0  ;;  %v1763_v21 = vld [vmem:[%s2271_s3] sm:$0xff]  }
 0x104   : > { %v610_v29 = vmax.f32 %v508_v23, 0.0  ;;  %v511_v30 = vadd.f32 %v2021_v51, %v510_v28  ;;  %1652 = vmatprep.subr.bf16.mxu1 %v1763_v21 }
 0x105   : > { %690 = vst.msk [vmem:[#allocation2 + $0x91] sm:$0xff] %vm388_vm1, %v612_v26  ;;  %v613_v31 = vmax.f32 %v519_v27, 0.0  ;;  %v899_v27 = vld [vmem:[#allocation2 + $0x1a] ss:$2 sm:$0xff]  ;;  %1653 = vmatpush3.bf16.msra.mxu1 %v1763_v21 }
 0x106   : > { %688 = vst.msk [vmem:[#allocation2 + $0x79] sm:$0xff] %vm388_vm1, %v610_v29  ;;  %v611_v32 = vmax.f32 %v511_v30, 0.0  ;;  %v942_v34 = vld [vmem:[#allocation2 + $0x60] ss:$2 sm:$0xff]  ;;  %v983_v37 = vld [vmem:[#allocation2 + $0x61] ss:$2 sm:$0xff] }
 0x107   : > { %691 = vst.msk [vmem:[#allocation2 + $0x99] sm:$0xff] %vm388_vm1, %v613_v31  ;;  %v955_v35 = vpack.c.bf16 %v942_v34, %v940_v33  ;;  %v996_v46 = vpack.c.bf16 %v983_v37, %v981_v42  ;;  %v1024_v49 = vld [vmem:[#allocation2 + $0x62] ss:$2 sm:$0xff]  ;;  %v860_v10 = vld [vmem:[#allocation2 + $0x49] ss:$2 sm:$0xff] }
 0x108   : > { %689 = vst.msk [vmem:[#allocation2 + $0x81] sm:$0xff] %vm388_vm1, %v611_v32  ;;  %v1634_v36 = vpop.f32.mrb[12].mxu0  ;;  %v781_v54 = vld [vmem:[#allocation2 + $0x62] ss:$2 sm:$0xff]  ;;  %v1037_v56 = vpack.c.bf16 %v1024_v49, %v1022_v52  ;;  %v873_v17 = vpack.c.bf16 %v860_v10, %v858_v12 }
 0x109   : > { %v532_v38 = vadd.f32 %v1634_v36, %v2021_v51  ;;  %963 = vrot.lane.b32.xlu0 %v955_v35, %s1833_s17  ;;  %v523_v39 = vpop.f32.mrb[13].mxu0  ;;  %v819_v59 = vld [vmem:[#allocation2 + $0x48] ss:$2 sm:$0xff] }
 0x10a   : > { %v524_v40 = vadd.f32 %v2021_v51, %v523_v39  ;;  %v1635_v41 = vpop.f32.mrb[14].mxu0  ;;  %v716_v1 = vld [vmem:[#allocation2 + $0x60] ss:$2 sm:$0xff]  ;;  %v832_v6 = vpack.c.bf16 %v819_v59, %v817_v62 }
 0x10b   : > { %v616_v43 = vmax.f32 %v532_v38, 0.0  ;;  %v535_v44 = vadd.f32 %v1635_v41, %v2021_v51  ;;  %v526_v45 = vpop.f32.mrb[15].mxu0  ;;  %v901_v20 = vld [vmem:[#allocation2 + $0x4a] ss:$2 sm:$0xff] }
 0x10c   : > { %v614_v47 = vmax.f32 %v524_v40, 0.0  ;;  %v527_v48 = vadd.f32 %v2021_v51, %v526_v45  ;;  %v914_v32 = vpack.c.bf16 %v901_v20, %v899_v27  ;;  %v740_v40 = vld [vmem:[#allocation2 + $0x61] ss:$2 sm:$0xff] }
 0x10d   : > { %694 = vst.msk [vmem:[#allocation2 + $0xc1] sm:$0xff] %vm388_vm1, %v616_v43  ;;  %v617_v50 = vmax.f32 %v535_v44, 0.0  ;;  %1004 = vrot.lane.b32.xlu0 %v996_v46, %s2278_s21 }
 0x10e   : > { %692 = vst.msk [vmem:[#allocation2 + $0xa9] sm:$0xff] %vm388_vm1, %v614_v47  ;;  %v615_v53 = vmax.f32 %v527_v48, 0.0  ;;  %v783_v55 = vld [vmem:[#allocation2 + $0x92] ss:$2 sm:$0xff]  ;;  %v985_v26 = vld [vmem:[#allocation2 + $0x91] ss:$2 sm:$0xff] }
 0x10f   : > { %695 = vst.msk [vmem:[#allocation2 + $0xc9] sm:$0xff] %vm388_vm1, %v617_v50  ;;  %v793_v57 = vpack.c.bf16 %v783_v55, %v781_v54  ;;  %v718_v2 = vld [vmem:[#allocation2 + $0x90] ss:$2 sm:$0xff]  ;;  %v742_v36 = vld [vmem:[#allocation2 + $0x91] ss:$2 sm:$0xff]  ;;  %v1764_v47 = vld [vmem:[%s2271_s3 + $0x8] sm:$0xff]  }
 0x110   : > { %693 = vst.msk [vmem:[#allocation2 + $0xb1] sm:$0xff] %vm388_vm1, %v615_v53  ;;  %v1638_v58 = vpop.f32.mrb[16].mxu0  ;;  %v728_v7 = vpack.c.bf16 %v718_v2, %v716_v1  ;;  %v944_v14 = vld [vmem:[#allocation2 + $0x90] ss:$2 sm:$0xff]  ;;  %v752_v42 = vpack.c.bf16 %v742_v36, %v740_v40  ;;  %v862_v44 = vld [vmem:[#allocation2 + $0x79] ss:$2 sm:$0xff]  ;;  %1654 = vmatprep.subr.bf16.mxu1 %v1764_v47 }
 0x111   : > { %v548_v60 = vadd.f32 %v1638_v58, %v2021_v51  ;;  %1045 = vrot.lane.b32.xlu0 %v1037_v56, %s1835_s22  ;;  %802 = vrot.lane.b32.xlu1 %v793_v57, %s1831_s14  ;;  %v539_v61 = vpop.f32.mrb[17].mxu0  ;;  %v821_v39 = vld [vmem:[#allocation2 + $0x78] ss:$2 sm:$0xff]  ;;  %v1765_v57 = vld [vmem:[%s2271_s3 + $0x10] ss:$0 sps:$4 sm:$0x33]  }
 0x112   : > { %v540_v63 = vadd.f32 %v2021_v51, %v539_v61  ;;  %v1639_v0 = vpop.f32.mrb[18].mxu0  ;;  %732 = vst.msk [vmem:[#allocation3 + $0x8] sm:$0xff] %vm388_vm1, %v728_v7  ;;  %v1026_v55 = vld [vmem:[#allocation2 + $0x92] ss:$2 sm:$0xff]  ;;  %1655 = vmatpush3.bf16.msra.mxu1 %v1764_v47 }
 0x113   : > { %v620_v3 = vmax.f32 %v548_v60, 0.0  ;;  %v551_v4 = vadd.f32 %v1639_v0, %v2021_v51  ;;  %v542_v5 = vpop.f32.mrb[19].mxu0  ;;  %1711 = vmatprep.subr.msk.bf16.mxu1 %vm437_vm0, %v1765_v57 }
 0x114   : > { %v618_v8 = vmax.f32 %v540_v63, 0.0  ;;  %v543_v9 = vadd.f32 %v2021_v51, %v542_v5 }
 0x115   : > { %698 = vst.msk [vmem:[#allocation2 + $0xf1] sm:$0xff] %vm388_vm1, %v620_v3  ;;  %v621_v11 = vmax.f32 %v551_v4, 0.0  ;;  %840 = vrot.lane.b32.xlu0 %v832_v6, %s1836_s23  ;;  %v1107_v3 = vsel %vm437_vm0, %v1765_v57, 0  ;;  %v903_v6 = vld [vmem:[#allocation2 + $0x7a] ss:$2 sm:$0xff] }
 0x116   : > { %696 = vst.msk [vmem:[#allocation2 + $0xd9] sm:$0xff] %vm388_vm1, %v618_v8  ;;  %v619_v13 = vmax.f32 %v543_v9, 0.0  ;;  %v946_v15 = vld [vmem:[#allocation2 + $0xc0] ss:$2 sm:$0xff]  ;;  %v987_v19 = vld [vmem:[#allocation2 + $0xc1] ss:$2 sm:$0xff]  ;;  %1657 = vmatpush3.bf16.msra.mxu1 %v1107_v3 }
 0x117   : > { %699 = vst.msk [vmem:[#allocation2 + $0xf9] sm:$0xff] %vm388_vm1, %v621_v11  ;;  %v956_v16 = vpack.c.bf16 %v946_v15, %v944_v14  ;;  %v997_v31 = vpack.c.bf16 %v987_v19, %v985_v26  ;;  %v823_v35 = vld [vmem:[#allocation2 + $0xa8] ss:$2 sm:$0xff]  ;;  %v864_v45 = vld [vmem:[#allocation2 + $0xa9] ss:$2 sm:$0xff] }
 0x118   : > { %697 = vst.msk [vmem:[#allocation2 + $0xe1] sm:$0xff] %vm388_vm1, %v619_v13  ;;  %v1642_v18 = vpop.f32.mrb[20].mxu0  ;;  %v833_v41 = vpack.c.bf16 %v823_v35, %v821_v39  ;;  %v1028_v46 = vld [vmem:[#allocation2 + $0xc2] ss:$2 sm:$0xff]  ;;  %v874_v61 = vpack.c.bf16 %v864_v45, %v862_v44 }
 0x119   : > { %v564_v22 = vadd.f32 %v1642_v18, %v2021_v51  ;;  %965 = vrot.lane.b32.xlu1 %v956_v16, %s1833_s17  ;;  %v555_v23 = vpop.f32.mrb[21].mxu0  ;;  %881 = vrot.lane.b32.xlu0 %v873_v17, %s1837_s26  ;;  %v720_v50 = vld [vmem:[#allocation2 + $0xc0] ss:$2 sm:$0xff]  ;;  %v1038_v62 = vpack.c.bf16 %v1028_v46, %v1026_v55  ;;  %v744_v17 = vld [vmem:[#allocation2 + $0xc1] ss:$2 sm:$0xff] }
 0x11a   : > { %v556_v24 = vadd.f32 %v2021_v51, %v555_v23  ;;  %v1643_v25 = vpop.f32.mrb[22].mxu0  ;;  %v905_v1 = vld [vmem:[#allocation2 + $0xaa] ss:$2 sm:$0xff] }
 0x11b   : > { %v624_v28 = vmax.f32 %v564_v22, 0.0  ;;  %v567_v29 = vadd.f32 %v1643_v25, %v2021_v51  ;;  %v558_v30 = vpop.f32.mrb[23].mxu0  ;;  %v785_v7 = vld [vmem:[#allocation2 + $0xc2] ss:$2 sm:$0xff]  ;;  %v915_v8 = vpack.c.bf16 %v905_v1, %v903_v6 }
 0x11c   : > { %v622_v33 = vmax.f32 %v556_v24, 0.0  ;;  %v559_v34 = vadd.f32 %v2021_v51, %v558_v30 }
 0x11d   : > { %702 = vst.msk [vmem:[#allocation2 + $0x121] sm:$0xff] %vm388_vm1, %v624_v28  ;;  %v625_v37 = vmax.f32 %v567_v29, 0.0  ;;  %1006 = vrot.lane.b32.xlu1 %v997_v31, %s2278_s21  ;;  %922 = vrot.lane.b32.xlu0 %v914_v32, %s1838_s28  ;;  %s2282_s21 = smov 28  }
 0x11e   : > { %700 = vst.msk [vmem:[#allocation2 + $0x109] sm:$0xff] %vm388_vm1, %v622_v33  ;;  %v623_v38 = vmax.f32 %v559_v34, 0.0  ;;  %v722_v52 = vld [vmem:[#allocation2 + $0xf0] ss:$2 sm:$0xff]  ;;  %v746_v11 = vld [vmem:[#allocation2 + $0xf1] ss:$2 sm:$0xff] }
 0x11f   : > { %703 = vst.msk [vmem:[#allocation2 + $0x129] sm:$0xff] %vm388_vm1, %v625_v37  ;;  %v729_v56 = vpack.c.bf16 %v722_v52, %v720_v50  ;;  %v787_v2 = vld [vmem:[#allocation2 + $0xf2] ss:$2 sm:$0xff]  ;;  %v753_v22 = vpack.c.bf16 %v746_v11, %v744_v17  ;;  %v989_v28 = vld [vmem:[#allocation2 + $0xf1] ss:$2 sm:$0xff] }
 0x120   : > { %701 = vst.msk [vmem:[#allocation2 + $0x111] sm:$0xff] %vm388_vm1, %v623_v38  ;;  %v1646_v43 = vpop.f32.mrb[24].mxu0  ;;  %v794_v9 = vpack.c.bf16 %v787_v2, %v785_v7  ;;  %v948_v18 = vld [vmem:[#allocation2 + $0xf0] ss:$2 sm:$0xff]  ;;  %v866_v45 = vld [vmem:[#allocation2 + $0xd9] ss:$2 sm:$0xff] }
 0x121   : > { %v580_v48 = vadd.f32 %v1646_v43, %v2021_v51  ;;  %v571_v49 = vpop.f32.mrb[25].mxu0  ;;  %842 = vrot.lane.b32.xlu1 %v833_v41, %s1836_s23  ;;  %761 = vrot.lane.b32.xlu0 %v752_v42, %s1832_s16  ;;  %733 = vst.msk [vmem:[#allocation3 + $0x10] sm:$0xff] %vm388_vm1, %v729_v56  ;;  %v825_v38 = vld [vmem:[#allocation2 + $0xd8] ss:$2 sm:$0xff] }
 0x122   : > { %v572_v53 = vadd.f32 %v2021_v51, %v571_v49  ;;  %v1647_v54 = vpop.f32.mrb[26].mxu0  ;;  %v907_v52 = vld [vmem:[#allocation2 + $0xda] ss:$2 sm:$0xff] }
 0x123   : > { %v628_v58 = vmax.f32 %v580_v48, 0.0  ;;  %v583_v59 = vadd.f32 %v1647_v54, %v2021_v51  ;;  %v574_v60 = vpop.f32.mrb[27].mxu0 }
 0x124   : > { %v626_v63 = vmax.f32 %v572_v53, 0.0  ;;  %v575_v0 = vadd.f32 %v2021_v51, %v574_v60 }
 0x125   : > { %706 = vst.msk [vmem:[#allocation2 + $0x151] sm:$0xff] %vm388_vm1, %v628_v58  ;;  %v629_v4 = vmax.f32 %v583_v59, 0.0  ;;  %883 = vrot.lane.b32.xlu1 %v874_v61, %s1837_s26  ;;  %1047 = vrot.lane.b32.xlu0 %v1038_v62, %s1835_s22  ;;  %v1030_v58 = vld [vmem:[#allocation2 + $0xf2] ss:$2 sm:$0xff] }
 0x126   : > { %704 = vst.msk [vmem:[#allocation2 + $0x139] sm:$0xff] %vm388_vm1, %v626_v63  ;;  %v627_v5 = vmax.f32 %v575_v0, 0.0  ;;  %v950_v12 = vld [vmem:[#allocation2 + $0x120] ss:$2 sm:$0xff]  ;;  %v991_v26 = vld [vmem:[#allocation2 + $0x121] ss:$2 sm:$0xff] }
 0x127   : > { %707 = vst.msk [vmem:[#allocation2 + $0x159] sm:$0xff] %vm388_vm1, %v629_v4  ;;  %v957_v23 = vpack.c.bf16 %v950_v12, %v948_v18  ;;  %v748_v30 = vld [vmem:[#allocation2 + $0x121] ss:$2 sm:$0xff]  ;;  %v998_v33 = vpack.c.bf16 %v991_v26, %v989_v28  ;;  %v827_v34 = vld [vmem:[#allocation2 + $0x108] ss:$2 sm:$0xff] }
 0x128   : > { %705 = vst.msk [vmem:[#allocation2 + $0x141] sm:$0xff] %vm388_vm1, %v627_v5  ;;  %v1650_v10 = vpop.f32.mrb[28].mxu0  ;;  %v724_v35 = vld [vmem:[#allocation2 + $0x120] ss:$2 sm:$0xff]  ;;  %v834_v41 = vpack.c.bf16 %v827_v34, %v825_v38  ;;  %v868_v42 = vld [vmem:[#allocation2 + $0x109] ss:$2 sm:$0xff] }
 0x129   : > { %v596_v13 = vadd.f32 %v1650_v10, %v2021_v51  ;;  %v587_v14 = vpop.f32.mrb[29].mxu0  ;;  %924 = vrot.lane.b32.xlu1 %v915_v8, %s1838_s28  ;;  %804 = vrot.lane.b32.xlu0 %v794_v9, %s1831_s14  ;;  %v789_v37 = vld [vmem:[#allocation2 + $0x122] ss:$2 sm:$0xff]  ;;  %v875_v47 = vpack.c.bf16 %v868_v42, %v866_v45 }
 0x12a   : > { %v588_v15 = vadd.f32 %v2021_v51, %v587_v14  ;;  %v1651_v16 = vpop.f32.mrb[30].mxu0  ;;  %v909_v49 = vld [vmem:[#allocation2 + $0x10a] ss:$2 sm:$0xff] }
 0x12b   : > { %v632_v19 = vmax.f32 %v596_v13, 0.0  ;;  %v599_v20 = vadd.f32 %v1651_v16, %v2021_v51  ;;  %v590_v21 = vpop.f32.mrb[31].mxu0  ;;  %v916_v54 = vpack.c.bf16 %v909_v49, %v907_v52  ;;  %v1032_v56 = vld [vmem:[#allocation2 + $0x122] ss:$2 sm:$0xff] }
 0x12c   : > { %v630_v24 = vmax.f32 %v588_v15, 0.0  ;;  %v591_v25 = vadd.f32 %v2021_v51, %v590_v21  ;;  %v1039_v60 = vpack.c.bf16 %v1032_v56, %v1030_v58 }
 0x12d   : > { %710 = vst.msk [vmem:[#allocation2 + $0x181] sm:$0xff] %vm388_vm1, %v632_v19  ;;  %v633_v27 = vmax.f32 %v599_v20, 0.0  ;;  %763 = vrot.lane.b32.xlu1 %v753_v22, %s1832_s16  ;;  %967 = vrot.lane.b32.xlu0 %v957_v23, %s1833_s17 }
 0x12e   : > { %708 = vst.msk [vmem:[#allocation2 + $0x169] sm:$0xff] %vm388_vm1, %v630_v24  ;;  %v631_v29 = vmax.f32 %v591_v25, 0.0  ;;  %v750_v31 = vld [vmem:[#allocation2 + $0x151] ss:$2 sm:$0xff]  ;;  %v791_v51 = vld [vmem:[#allocation2 + $0x152] ss:$2 sm:$0xff] }
 0x12f   : > { %711 = vst.msk [vmem:[#allocation2 + $0x189] sm:$0xff] %vm388_vm1, %v633_v27  ;;  %v754_v32 = vpack.c.bf16 %v750_v31, %v748_v30  ;;  %v726_v36 = vld [vmem:[#allocation2 + $0x150] ss:$2 sm:$0xff]  ;;  %v795_v40 = vpack.c.bf16 %v791_v51, %v789_v37  ;;  %v993_v50 = vld [vmem:[#allocation2 + $0x151] ss:$2 sm:$0xff] }
 0x130   : > { %709 = vst.msk [vmem:[#allocation2 + $0x171] sm:$0xff] %vm388_vm1, %v631_v29  ;;  %v730_v39 = vpack.c.bf16 %v726_v36, %v724_v35  ;;  %v952_v43 = vld [vmem:[#allocation2 + $0x150] ss:$2 sm:$0xff]  ;;  %v870_v62 = vld [vmem:[#allocation2 + $0x139] ss:$2 sm:$0xff] }
 0x131   : > { %765 = vrot.lane.b32.xlu1 %v754_v32, %s1832_s16  ;;  %1008 = vrot.lane.b32.xlu0 %v998_v33, %s2282_s21  ;;  %v829_v57 = vld [vmem:[#allocation2 + $0x138] ss:$2 sm:$0xff]  ;;  %s323_s16 = sand.u32 1, %s1820_s10  }
 0x132   : > { %734 = vst.msk [vmem:[#allocation3 + $0x18] sm:$0xff] %vm388_vm1, %v730_v39  ;;  %v911_v1 = vld [vmem:[#allocation2 + $0x13a] ss:$2 sm:$0xff] }
 0x133   : > { %v1034_v4 = vld [vmem:[#allocation2 + $0x152] ss:$2 sm:$0xff] }
 0x135   : > { %806 = vrot.lane.b32.xlu1 %v795_v40, %s1831_s14  ;;  %844 = vrot.lane.b32.xlu0 %v834_v41, %s1836_s23  ;;  %v1186_v41 = vld [vmem:[%s2273_s5] sm:$0x3] }
 0x136   : > { %v954_v44 = vld [vmem:[#allocation2 + $0x180] ss:$2 sm:$0xff]  ;;  %v995_v48 = vld [vmem:[#allocation2 + $0x181] ss:$2 sm:$0xff]  ;;  %1712 = vmatprep.subr.msk.bf16.mxu1 %vm437_vm0, %v1186_v41  ;;  %v1207_v42 = vsel %vm437_vm0, %v1186_v41, 0 }
 0x137   : > { %v958_v46 = vpack.c.bf16 %v954_v44, %v952_v43  ;;  %v999_v53 = vpack.c.bf16 %v995_v48, %v993_v50  ;;  %v831_v55 = vld [vmem:[#allocation2 + $0x168] ss:$2 sm:$0xff]  ;;  %v872_v61 = vld [vmem:[#allocation2 + $0x169] ss:$2 sm:$0xff]  ;;  %v1293_v43 = vld [vmem:[%s2275_s7] sm:$0x3] }
 0x138   : > { %v835_v59 = vpack.c.bf16 %v831_v55, %v829_v57  ;;  %v876_v63 = vpack.c.bf16 %v872_v61, %v870_v62  ;;  %v913_v0 = vld [vmem:[#allocation2 + $0x16a] ss:$2 sm:$0xff]  ;;  %v1552_v44 = vld [vmem:[%s2272_s4] ss:$0 sm:$0xff] }
 0x139   : > { %969 = vrot.lane.b32.xlu1 %v958_v46, %s1833_s17  ;;  %885 = vrot.lane.b32.xlu0 %v875_v47, %s1837_s26  ;;  %v917_v2 = vpack.c.bf16 %v913_v0, %v911_v1  ;;  %v1036_v3 = vld [vmem:[#allocation2 + $0x182] ss:$2 sm:$0xff]  ;;  %s1532_s17 = sshll.u32 %s323_s16, 6 }
 0x13a   : > { %v1040_v5 = vpack.c.bf16 %v1036_v3, %v1034_v4 }
 0x13d   : > { %1010 = vrot.lane.b32.xlu1 %v999_v53, %s2282_s21  ;;  %926 = vrot.lane.b32.xlu0 %v916_v54, %s1838_s28  ;;  %s1770_s21 = sshll.u32 %s1839_s25, 4  ;;  %s1771_s21 = int_to_ptr.vmem [resolvable:$false] %s1770_s21 }
 0x141   : > { %846 = vrot.lane.b32.xlu1 %v835_v59, %s1836_s23  ;;  %1049 = vrot.lane.b32.xlu0 %v1039_v60, %s1835_s22  ;;  %v1314_v60 = vsel %vm437_vm0, %v1293_v43, 0 }
 0x145   : > { %887 = vrot.lane.b32.xlu1 %v876_v63, %s1837_s26 }
 0x149   : > { %928 = vrot.lane.b32.xlu1 %v917_v2, %s1838_s28 }
 0x14d   : > { %1051 = vrot.lane.b32.xlu1 %v1040_v5, %s1835_s22  ;;  %s1583_s22 = sshll.u32 %s1912_s13, 10  ;;  %s2226_s13 = scalar_lea.sflag [#allocation5], %s323_s16 }
 0x14e   : > { %s2217_s29 = scalar_lea.hbm %s2277_s9, %s1583_s22 }
 0x173   : > { %v801_v6 = vpop.permute.xlu1 %800  ;;  %v760_v7 = vpop.permute.xlu0 %759 }
 0x174   : > { %772 = vst.msk [vmem:[#allocation3] sm:$0xff] %vm771_vm4, %v760_v7  ;;  %v1274_v7 = vld [vmem:[%s1949_s27] ss:$2 sm:$0xff] }
 0x175   : > { %813 = vst.msk [vmem:[#allocation3] sm:$0xff] %vm812_vm5, %v801_v6 }
 0x17b   : > { %v964_v8 = vpop.permute.xlu0 %963 }
 0x17f   : > { %v1005_v9 = vpop.permute.xlu0 %1004 }
 0x183   : > { %v1046_v10 = vpop.permute.xlu0 %1045  ;;  %v803_v11 = vpop.permute.xlu1 %802 }
 0x187   : > { %v841_v12 = vpop.permute.xlu0 %840 }
 0x188   : > { %853 = vst.msk [vmem:[#allocation3] sm:$0xff] %vm852_vm6, %v841_v12 }
 0x18b   : > { %v966_v13 = vpop.permute.xlu1 %965  ;;  %v882_v14 = vpop.permute.xlu0 %881 }
 0x18c   : > { %894 = vst.msk [vmem:[#allocation3] sm:$0xff] %vm893_vm7, %v882_v14  ;;  %v1566_v14 = vld [vmem:[%s1949_s27 + $0x40] ss:$2 sm:$0xff] }
 0x18f   : > { %v1007_v15 = vpop.permute.xlu1 %1006  ;;  %v923_v16 = vpop.permute.xlu0 %922 }
 0x190   : > { %935 = vst.msk [vmem:[#allocation3] sm:$0xff] %vm934_vm8, %v923_v16  ;;  %v1568_v16 = vld [vmem:[%s1949_s27 + $0x80] ss:$2 sm:$0xff] }
 0x191   : > { %976 = vst.msk [vmem:[#allocation3] sm:$0xff] %vm975_vm9, %v964_v8  ;;  %v1565_v8 = vld [vmem:[%s1949_s27 + $0x20] ss:$2 sm:$0xff] }
 0x192   : > { %1017 = vst.msk [vmem:[#allocation3] sm:$0xff] %vm1016_vm10, %v1005_v9 }
 0x193   : > { %1058 = vst.msk [vmem:[#allocation3] sm:$0xff] %vm1057_vm11, %v1046_v10  ;;  %v843_v17 = vpop.permute.xlu1 %842  ;;  %v762_v18 = vpop.permute.xlu0 %761 }
 0x194   : > { %773 = vst.msk [vmem:[#allocation3 + $0x8] sm:$0xff] %vm771_vm4, %v762_v18 }
 0x195   : > { %814 = vst.msk [vmem:[#allocation3 + $0x8] sm:$0xff] %vm812_vm5, %v803_v11 }
 0x196   : > { %854 = vst.msk [vmem:[#allocation3 + $0x8] sm:$0xff] %vm852_vm6, %v843_v17  ;;  %v1569_v17 = vld [vmem:[%s1949_s27 + $0xa0] ss:$2 sm:$0xff] }
 0x197   : > { %v884_v19 = vpop.permute.xlu1 %883  ;;  %v1048_v20 = vpop.permute.xlu0 %1047 }
 0x198   : > { %895 = vst.msk [vmem:[#allocation3 + $0x8] sm:$0xff] %vm893_vm7, %v884_v19  ;;  %v1291_v19 = vpack.c.bf16 %v1569_v17, %v1568_v16 }
 0x19a   : > { %v1062_v21 = vld [vmem:[#allocation3] sm:$0xff] }
 0x19b   : > { %v925_v22 = vpop.permute.xlu1 %924  ;;  %1658 = vmatprep.mubr.msk.bf16.mxu1 %vm1093_vm12, %v1062_v21  ;;  %v805_v23 = vpop.permute.xlu0 %804  ;;  %v1571_v21 = vld [vmem:[%s1949_s27 + $0xe0] ss:$2 sm:$0xff] }
 0x19c   : > { %936 = vst.msk [vmem:[#allocation3 + $0x8] sm:$0xff] %vm934_vm8, %v925_v22 }
 0x19d   : > { %977 = vst.msk [vmem:[#allocation3 + $0x8] sm:$0xff] %vm975_vm9, %v966_v13  ;;  %v1289_v13 = vpack.c.bf16 %v1565_v8, %v1274_v7 }
 0x19e   : > { %1018 = vst.msk [vmem:[#allocation3 + $0x8] sm:$0xff] %vm1016_vm10, %v1007_v15  ;;  %v1567_v15 = vld [vmem:[%s1949_s27 + $0x60] ss:$2 sm:$0xff] }
 0x19f   : > { %1059 = vst.msk [vmem:[#allocation3 + $0x8] sm:$0xff] %vm1057_vm11, %v1048_v20  ;;  %v764_v24 = vpop.permute.xlu1 %763  ;;  %v968_v25 = vpop.permute.xlu0 %967  ;;  %v1290_v18 = vpack.c.bf16 %v1567_v15, %v1566_v14  ;;  %v1570_v20 = vld [vmem:[%s1949_s27 + $0xc0] ss:$2 sm:$0xff]  ;;  %s325_s27 = scalar_lea.vmem [#allocation4], %s1532_s17  ;;  %s1772_s17 = scalar_lea.vmem %s1771_s21, 2048 }
 0x1a0   : > { %774 = vst.msk [vmem:[#allocation3 + $0x10] sm:$0xff] %vm771_vm4, %v764_v24  ;;  %v1292_v22 = vpack.c.bf16 %v1571_v21, %v1570_v20  ;;  %v1572_v24 = vld [vmem:[%s2276_s8] ss:$0 sm:$0xff]  ;;  %s1420_s23 = sshll.u32 %s325_s27, 4  ;;  %s2220_s23 = int_to_ptr.vmem [resolvable:$true] %s1420_s23 }
 0x1a1   : > { %815 = vst.msk [vmem:[#allocation3 + $0x10] sm:$0xff] %vm812_vm5, %v805_v23  ;;  %v1560_v23 = vld [vmem:[%s2274_s6] ss:$0 sm:$0xff]  ;;  %s1766_s24 = scalar_lea.vmem %s2220_s23, 1024  ;;  %p1773_p0 = scmp.lt.s32.totalorder %s2220_s23, %s1771_s21 }
 0x1a2   : > { %p1767_p11 = scmp.ne.s32.totalorder %s2220_s23, %s1766_s24  ;;  %p1774_p1 = scmp.lt.s32.totalorder %s1772_s17, %s1766_s24 }
 0x1a3   : > { %v766_v26 = vpop.permute.xlu1 %765  ;;  %v1009_v27 = vpop.permute.xlu0 %1008 }
 0x1a4   : > { %775 = vst.msk [vmem:[#allocation3 + $0x18] sm:$0xff] %vm771_vm4, %v766_v26  ;;  %p1768_p12 = pnand %p1767_p11, %p1929_p5  ;;  %p1775_p2 = por %p1774_p1, %p1773_p0 }
 0x1a6   : > { %v1063_v28 = vld [vmem:[#allocation3 + $0x8] sm:$0xff]  ;;  %p1769_p13 = pneg %p1768_p12 }
 0x1a7   : > { %v807_v29 = vpop.permute.xlu1 %806  ;;  %1659 = vmatmul.mubr.msk.bf16.vlgmr.msra.gmra.mrb[0].mxu1 %vm1093_vm12, %v1063_v28  ;;  %v845_v30 = vpop.permute.xlu0 %844 }
 0x1a8   : > { %816 = vst.msk [vmem:[#allocation3 + $0x18] sm:$0xff] %vm812_vm5, %v807_v29  ;;  %1667 = vmatpush3.bf16.msra.mxu1 %v1207_v42  ;;  %p1776_p3 = pnand %p1775_p2, %p1769_p13 }
 0x1a9   : > { %855 = vst.msk [vmem:[#allocation3 + $0x10] sm:$0xff] %vm852_vm6, %v845_v30  ;;  %1713 = vmatprep.subr.msk.bf16.mxu1 %vm437_vm0, %v1293_v43 }
 0x1ab   : > { %v970_v31 = vpop.permute.xlu1 %969  ;;  %v886_v32 = vpop.permute.xlu0 %885 }
 0x1ac   : > { %896 = vst.msk [vmem:[#allocation3 + $0x10] sm:$0xff] %vm893_vm7, %v886_v32 }
 0x1af   : > { %v1011_v33 = vpop.permute.xlu1 %1010  ;;  %v927_v51 = vpop.permute.xlu0 %926 }
 0x1b0   : > { %937 = vst.msk [vmem:[#allocation3 + $0x10] sm:$0xff] %vm934_vm8, %v927_v51 }
 0x1b1   : > { %978 = vst.msk [vmem:[#allocation3 + $0x10] sm:$0xff] %vm975_vm9, %v968_v25  ;;  %v1692_v25 = vadd.f32 %v1572_v24, %v1560_v23 }
 0x1b2   : > { %1019 = vst.msk [vmem:[#allocation3 + $0x10] sm:$0xff] %vm1016_vm10, %v1009_v27 }
 0x1b3   : > { %v847_v34 = vpop.permute.xlu1 %846  ;;  %v1050_v35 = vpop.permute.xlu0 %1049 }
 0x1b4   : > { %856 = vst.msk [vmem:[#allocation3 + $0x18] sm:$0xff] %vm852_vm6, %v847_v34 }
 0x1b5   : > { %1060 = vst.msk [vmem:[#allocation3 + $0x10] sm:$0xff] %vm1057_vm11, %v1050_v35 }
 0x1b7   : > { %v888_v36 = vpop.permute.xlu1 %887 }
 0x1b8   : > { %897 = vst.msk [vmem:[#allocation3 + $0x18] sm:$0xff] %vm893_vm7, %v888_v36 }
 0x1bb   : > { %v929_v37 = vpop.permute.xlu1 %928 }
 0x1bc   : > { %v1064_v38 = vld [vmem:[#allocation3 + $0x10] sm:$0xff]  ;;  %938 = vst.msk [vmem:[#allocation3 + $0x18] sm:$0xff] %vm934_vm8, %v929_v37 }
 0x1bd   : > { %1662 = vmatprep.mubr.msk.bf16.mxu1 %vm1093_vm12, %v1064_v38  ;;  %979 = vst.msk [vmem:[#allocation3 + $0x18] sm:$0xff] %vm975_vm9, %v970_v31 }
 0x1be   : > { %1020 = vst.msk [vmem:[#allocation3 + $0x18] sm:$0xff] %vm1016_vm10, %v1011_v33 }
 0x1bf   : > { %v1052_v39 = vpop.permute.xlu1 %1051 }
 0x1c0   : > { %1061 = vst.msk [vmem:[#allocation3 + $0x18] sm:$0xff] %vm1057_vm11, %v1052_v39 }
 0x1c7   : > { %v1065_v40 = vld [vmem:[#allocation3 + $0x18] sm:$0xff] }
 0x1c8   : > { %1663 = vmatmul.mubr.msk.bf16.gmra.mrb[4].mxu1 %vm1093_vm12, %v1065_v40 }
 0x27a   : > { %v1660_v45 = vpop.f32.mrb[0].mxu1 }
 0x27b   : > { %v1152_v46 = vadd.f32 %v1660_v45, %v1552_v44  ;;  %v1143_v47 = vpop.f32.mrb[1].mxu1 }
 0x27c   : > { %v1144_v48 = vadd.f32 %v1552_v44, %v1143_v47  ;;  %v1661_v49 = vpop.f32.mrb[2].mxu1 }
 0x27d   : > { %v1155_v50 = vadd.f32 %v1661_v49, %v1552_v44  ;;  %v1146_v52 = vpop.f32.mrb[3].mxu1  ;;  %v1176_v54 = vmax.f32 %v1152_v46, 0.0 }
 0x27e   : > { %v1147_v53 = vadd.f32 %v1552_v44, %v1146_v52  ;;  %v1174_v56 = vmax.f32 %v1144_v48, 0.0 }
 0x27f   : > { %v1177_v55 = vmax.f32 %v1155_v50, 0.0 }
 0x280   : > { %v1175_v57 = vmax.f32 %v1147_v53, 0.0 }
 0x281   : > { %v1183_v58 = vpack.c.bf16 %v1177_v55, %v1176_v54 }
 0x282   : > { %v1182_v59 = vpack.c.bf16 %v1175_v57, %v1174_v56 }
 0x284   : > { %1668 = vmatprep.mubr.msk.bf16.mxu1 %vm388_vm1, %v1182_v59 }
 0x285   : > { %1669 = vmatmul.mubr.msk.bf16.vlgmr.msra.gmra.mrb[8].mxu1 %vm388_vm1, %v1183_v58 }
 0x286   : > { %1677 = vmatpush3.bf16.msra.mxu1 %v1314_v60 }
 0x29b   : > { %v1664_v61 = vpop.f32.mrb[4].mxu1 }
 0x29c   : > { %v1168_v62 = vadd.f32 %v1664_v61, %v1552_v44  ;;  %v1159_v63 = vpop.f32.mrb[5].mxu1 }
 0x29d   : > { %v1160_v0 = vadd.f32 %v1552_v44, %v1159_v63  ;;  %v1665_v1 = vpop.f32.mrb[6].mxu1 }
 0x29e   : > { %v1171_v2 = vadd.f32 %v1665_v1, %v1552_v44  ;;  %v1162_v3 = vpop.f32.mrb[7].mxu1  ;;  %v1180_v5 = vmax.f32 %v1168_v62, 0.0 }
 0x29f   : > { %v1163_v4 = vadd.f32 %v1552_v44, %v1162_v3  ;;  %v1178_v9 = vmax.f32 %v1160_v0, 0.0 }
 0x2a0   : > { %v1181_v6 = vmax.f32 %v1171_v2, 0.0 }
 0x2a1   : > { %v1179_v10 = vmax.f32 %v1163_v4, 0.0 }
 0x2a2   : > { %v1185_v11 = vpack.c.bf16 %v1181_v6, %v1180_v5 }
 0x2a3   : > { %v1184_v12 = vpack.c.bf16 %v1179_v10, %v1178_v9 }
 0x2a5   : > { %1672 = vmatprep.mubr.msk.bf16.mxu1 %vm388_vm1, %v1184_v12 }
 0x2a6   : > { %1673 = vmatmul.mubr.msk.bf16.gmra.mrb[12].mxu1 %vm388_vm1, %v1185_v11 }
 0x2a7   : > { %1678 = vmatprep.mubr.msk.bf16.mxu1 %vm388_vm1, %v1289_v13 }
 0x2ae   : > { %1679 = vmatmul.mubr.msk.bf16.vlgmr.msra.gmra.mrb[8].mxu1 %vm388_vm1, %v1290_v18 }
 0x2af   : > { %1682 = vmatprep.mubr.msk.bf16.mxu1 %vm388_vm1, %v1291_v19 }
 0x2b6   : > { %1683 = vmatmul.mubr.msk.bf16.gmra.mrb[12].mxu1 %vm388_vm1, %v1292_v22 }
 0x381   : > { %v1680_v26 = vpop.f32.mrb[8].mxu1 }
 0x382   : > { %v1686_v27 = vadd.f32 %v1680_v26, %v1560_v23  ;;  %v1350_v28 = vpop.f32.mrb[9].mxu1 }
 0x383   : > { %v1688_v29 = vadd.f32 %v1560_v23, %v1350_v28  ;;  %v1681_v30 = vpop.f32.mrb[10].mxu1 }
 0x384   : > { %v1687_v31 = vadd.f32 %v1686_v27, %v1572_v24  ;;  %v1691_v32 = vadd.f32 %v1692_v25, %v1681_v30  ;;  %v1353_v33 = vpop.f32.mrb[11].mxu1 }
 0x385   : > { %v1689_v51 = vadd.f32 %v1688_v29, %v1572_v24  ;;  %v1693_v34 = vadd.f32 %v1692_v25, %v1353_v33 }
 0x386   : > { %v1391_v35 = vmax.f32 %v1687_v31, 0.0  ;;  %v1392_v36 = vmax.f32 %v1691_v32, 0.0 }
 0x387   : > { %v1389_v37 = vmax.f32 %v1689_v51, 0.0  ;;  %v1390_v38 = vmax.f32 %v1693_v34, 0.0 }
 0x388   : > { %1400 = vst.msk [vmem:[%s325_s27 + $0x10] sm:$0xff] %vm1397_vm13, %v1391_v35  ;;  %1401 = vst.msk [vmem:[%s325_s27 + $0x18] sm:$0xff] %vm1397_vm13, %v1392_v36 }
 0x389   : > { %1398 = vst.msk [vmem:[%s325_s27] sm:$0xff] %vm1397_vm13, %v1389_v37  ;;  %1399 = vst.msk [vmem:[%s325_s27 + $0x8] sm:$0xff] %vm1397_vm13, %v1390_v38  ;;  %v1684_v39 = vpop.f32.mrb[12].mxu1 }
 0x38a   : > { %v1695_v40 = vadd.f32 %v1692_v25, %v1684_v39  ;;  %v1366_v41 = vpop.f32.mrb[13].mxu1 }
 0x38b   : > { %v1697_v42 = vadd.f32 %v1692_v25, %v1366_v41  ;;  %v1685_v43 = vpop.f32.mrb[14].mxu1 }
 0x38c   : > { %v1395_v44 = vmax.f32 %v1695_v40, 0.0  ;;  %v1699_v45 = vadd.f32 %v1692_v25, %v1685_v43  ;;  %v1369_v46 = vpop.f32.mrb[15].mxu1 }
 0x38d   : > { %v1393_v47 = vmax.f32 %v1697_v42, 0.0  ;;  %v1701_v48 = vadd.f32 %v1692_v25, %v1369_v46 }
 0x38e   : > { %1404 = vst.msk [vmem:[%s325_s27 + $0x30] sm:$0xff] %vm1397_vm13, %v1395_v44  ;;  %v1396_v49 = vmax.f32 %v1699_v45, 0.0 }
 0x38f   : > { %1402 = vst.msk [vmem:[%s325_s27 + $0x20] sm:$0xff] %vm1397_vm13, %v1393_v47  ;;  %v1394_v50 = vmax.f32 %v1701_v48, 0.0 }
 0x390   : > { %1405 = vst.msk [vmem:[%s325_s27 + $0x38] sm:$0xff] %vm1397_vm13, %v1396_v49 }
 0x391   : > { %1403 = vst.msk [vmem:[%s325_s27 + $0x28] sm:$0xff] %vm1397_vm13, %v1394_v50 }
 0x392   : > { %1779 = shalt.err (!%p1776_p3)
}
 0x393   : > { %s1780_s16 = scalar_lea.hbm %s2217_s29, 1024  ;;  %s1784_s26 = scalar_lea.hbm %s2277_s9, 2048 }
 0x394   : > { %p1781_p4 = scmp.ne.s32.totalorder %s2217_s29, %s1780_s16  ;;  %p1785_p9 = scmp.lt.u32.totalorder %s2217_s29, %s2277_s9 }
 0x395   : > { %p1786_p10 = scmp.lt.u32.totalorder %s1784_s26, %s1780_s16  ;;  %p1788_p12 = scmp.lt.u32.totalorder %s1780_s16, %s2217_s29 }
 0x396   : > { %p1782_p7 = pnand %p1781_p4, %p1929_p5 }
 0x397   : > { %p1787_p11 = por %p1786_p10, %p1785_p9 }
 0x398   : > { %p1783_p8 = pneg %p1782_p7 }
 0x399   : > { %p1789_p13 = por %p1788_p12, %p1787_p11 }
 0x39b   : > { %p1790_p0 = pnand %p1789_p13, %p1783_p8 }
 0x39d   : > { %1793 = shalt.err (!%p1790_p0)
}
 0x39e   : > { %s1840_s24 = smov 128  }
 0x39f   : > { %1714 = dma.vmem_to_hbm [thread:$0]  (%p1929_p5), %s2220_s23, 1024, %s2217_s29, %s2226_s13, %s1840_s24, %s1840_s24, %s1831_s14  }
 0x3a0 PF: > { %p1720_p1 = scmp.ge.s32.totalorder %s1828_s12, 2  ;;  %s1435_s21 = sand.u32 1, %s1816_s30  }
 0x3a1   : > { %s1436_s17 = scalar_lea.sflag [#allocation5], %s1435_s21 }
 0x3a2   : > { %p1717_p2 = pnand %p1720_p1, %p1933_p6 }
 0x3a4   : > { %1811 = dma.done.wait (!%p1717_p2), %s1436_s17, 1024  }
 0x3a5   : > { %1813 = vsyncadd (!%p1717_p2), %s1436_s17, 4294966272  ;;  %p19_p3 = scmp.ge.s32.totalorder %s1916_s15, 4   ;;  %s2283_s30 = smov %s1820_s10 }
 0x3a6   : > { %s2284_s10 = smov %s1824_s11  ;;  %s2285_s11 = smov %s1927_s18 }
 0x3a7   : > { %s2286_s12 = smov %s1916_s15  ;;  %21 = sbr.rel (!%p19_p3) target bundleno = 3 (0x3), region = 170 }
 0x3ae   :  { %1441 = vsyncpa [#allocation5], 1 }
 0x3af   :  { %1443 = vsyncpa [#allocation5 + $0x1], 1 }

</bundles_post_ra>
